<compile_context>
chip_gen: v7x
topology: tpu7x:2x2x1
jax: 0.10.0
libtpu: 0.0.40
codegen_flags: <defaults>
</compile_context>

<pallas_src>
import functools

import jax
import jax.numpy as jnp
import numpy as np
from jax.experimental import pallas as pl
from jax.experimental.pallas import tpu as pltpu


def _conv_transpose_kernel(x_ref, w_ref, y_ref, stats_ref, xp_ref):
    """ConvTranspose2d(k=4, s=2) + center crop for one (sample, row-tile).

    Cropped output pixel (2p+sh, 2q+sw, co) is
        sum_{da,db in {0,1}} sum_ci
            xp[p+sh+da, q+sw+db, ci] * Wt[ci, co, 3-sh-2*da, 3-sw-2*db]
    with xp the 1-pixel zero-padded input.  Grouping by tap (a,b) = (sh+da,
    sw+db) gives 9 matmuls (M, Cin) @ (Cin, 4*Cp) whose columns are
    parity*Cp + co (parity = sh*2 + sw), accumulated in f32.

    x_ref     : (1, H, W, Cin)        bf16 full input sample (NHWC, Cin padded to 8k)
    w_ref     : (9, Cin, 4*Cp)        bf16 per-tap weights (built in the wrapper)
    y_ref     : (1, th*W, 4*Cp)       bf16 conv output tile, minor = parity*Cp+co
    stats_ref : (1, 1, 8, 4*Cp)       f32  row 0 = sum, row 1 = sum of squares
    xp_ref    : (th+2, W+2, Cin)      bf16 VMEM scratch, zero-padded row slab
    """
    t = pl.program_id(1)
    n_t = pl.num_programs(1)

    W = x_ref.shape[2]
    cin = x_ref.shape[3]
    th = xp_ref.shape[0] - 2
    r0 = t * th
    dt = xp_ref.dtype

    # ---- build the (th+2, W+2, Cin) zero-padded slab for this row tile ----
    # interior rows of this tile
    xp_ref[1:th + 1, 1:W + 1, :] = x_ref[0, pl.ds(r0, th), :, :]
    # zero only the 1-pixel border (no full-slab memset)
    xp_ref[:, 0:1, :] = jnp.zeros((th + 2, 1, cin), dt)
    xp_ref[:, W + 1:W + 2, :] = jnp.zeros((th + 2, 1, cin), dt)

    @pl.when(t == 0)
    def _():
        xp_ref[0:1, 1:W + 1, :] = jnp.zeros((1, W, cin), dt)

    @pl.when(t > 0)
    def _():
        xp_ref[0:1, 1:W + 1, :] = x_ref[0, pl.ds(r0 - 1, 1), :, :]

    @pl.when(t == n_t - 1)
    def _():
        xp_ref[th + 1:th + 2, 1:W + 1, :] = jnp.zeros((1, W, cin), dt)

    @pl.when(t < n_t - 1)
    def _():
        xp_ref[th + 1:th + 2, 1:W + 1, :] = x_ref[0, pl.ds(r0 + th, 1), :, :]

    # ---- 9 accumulated MXU matmuls, one per 3x3 tap (no im2col scratch) ----
    m = th * W
    acc = None
    for a in range(3):
        for b in range(3):
            lhs = xp_ref[a:a + th, b:b + W, :].reshape(m, cin)
            contrib = jnp.dot(lhs, w_ref[a * 3 + b],
                              preferred_element_type=jnp.float32)
            acc = contrib if acc is None else acc + contrib

    # lane-dense bf16 store (minor dim 4*Cp is a multiple of 128)
    y_ref[0] = acc.astype(y_ref.dtype)

    # ---- packed per-(sample, tile) BN partial sums (f32) ----
    stats_ref[...] = jnp.zeros_like(stats_ref)
    stats_ref[0, 0, 0:1, :] = jnp.sum(acc, axis=0, keepdims=True)
    stats_ref[0, 0, 1:2, :] = jnp.sum(acc * acc, axis=0, keepdims=True)


def _tile_bytes(shape, itemsize):
    """Conservative padded-VMEM size of one block (minor->128, 2nd-minor->16)."""
    s = list(shape)
    s[-1] = -(-s[-1] // 128) * 128
    if len(s) >= 2:
        s[-2] = -(-s[-2] // 16) * 16
    return int(np.prod(s)) * itemsize


def conv_transpose_block_2d(x_nchw, weight, gamma, beta, eps=1e-5, slope=0.2,
                            row_block=None):
    """Forward pass of ConvTransposeBlock2d.

    x_nchw : (N, Cin, H, W)      float32, NCHW (PyTorch convention)
    weight : (Cin, Cout, 4, 4)   ConvTranspose2d weight (PyTorch layout)
    gamma, beta : (Cout,)        BatchNorm2d affine parameters
    returns: (N, Cout, 2H, 2W)   NCHW float32
    """
    N, Cin, H, W = x_nchw.shape
    Cout = weight.shape[1]

    # Channel padding: 4*cp a multiple of 128 lanes (unmasked stores, and the
    # MXU processes >=128 columns anyway, so this is compute-free); contraction
    # dim padded to a sublane multiple.
    cp = ((Cout + 31) // 32) * 32
    c4 = 4 * cp
    cin_p = ((Cin + 7) // 8) * 8

    # Spatial row tile (grid axis 1): target 256-512 matmul rows per tile,
    # bounded VMEM regardless of H (v7x has only 64 MiB).
    if row_block is None:
        th = H
        for cand in range(1, H + 1):
            if H % cand == 0 and cand * W <= 512:
                th = cand
        if th * W > 512:          # W alone exceeds the target; 1-row tiles
            th = 1
        if H // th > 1 and (th * W) % 8 != 0:
            th = H                # keep block shapes (8,128)-legal
    else:
        th = int(row_block)
    assert H % th == 0, "row_block must divide H"
    T = H // th
    assert T == 1 or (th * W) % 8 == 0, "row tile must keep th*W a multiple of 8"

    # Input to NHWC bf16 (smallest tensor; cheap XLA transpose + cast).
    x = jnp.transpose(x_nchw, (0, 2, 3, 1)).astype(jnp.bfloat16)
    if cin_p != Cin:
        x = jnp.pad(x, ((0, 0), (0, 0), (0, 0), (0, cin_p - Cin)))

    # Per-tap weights: w_taps[a*3+b, ci, parity*cp + co] with parity = sh*2+sw,
    # zero where a parity does not use a tap / in the padded channel range.
    w_taps = jnp.zeros((9, cin_p, c4), jnp.float32)
    for a in range(3):
        for b in range(3):
            for sh in range(2):
                for sw in range(2):
                    da, db = a - sh, b - sw
                    if 0 <= da <= 1 and 0 <= db <= 1:
                        kh, kw = 3 - sh - 2 * da, 3 - sw - 2 * db
                        col = (sh * 2 + sw) * cp
                        w_taps = w_taps.at[a * 3 + b, :Cin,
                                           col:col + Cout].set(weight[:, :, kh, kw])
    w_taps = w_taps.astype(jnp.bfloat16)

    # Explicit scoped-VMEM limit: double-buffered in/out blocks + resident
    # weights + padded-input slab + f32 accumulator, with headroom.
    est = (2 * _tile_bytes((1, H, W, cin_p), 2)
           + _tile_bytes((9, cin_p, c4), 2)
           + 2 * _tile_bytes((1, th * W, c4), 2)
           + 2 * _tile_bytes((1, 1, 8, c4), 4)
           + _tile_bytes((th + 2, W + 2, cin_p), 2)
           + _tile_bytes((th * W, c4), 4))
    vmem_limit = min(max(2 * est + (4 << 20), 32 << 20), 100 << 20)

    y, stats = pl.pallas_call(
        _conv_transpose_kernel,
        grid=(N, T),
        in_specs=[
            # full sample stays resident across the spatial axis (index only
            # depends on n -> no re-DMA between row tiles of the same sample)
            pl.BlockSpec((1, H, W, cin_p), lambda n, t: (n, 0, 0, 0)),
            pl.BlockSpec((9, cin_p, c4), lambda n, t: (0, 0, 0)),
        ],
        out_specs=(
            pl.BlockSpec((1, th * W, c4), lambda n, t: (n, t, 0)),
            pl.BlockSpec((1, 1, 8, c4), lambda n, t: (n, t, 0, 0)),
        ),
        out_shape=(
            jax.ShapeDtypeStruct((N, H * W, c4), jnp.bfloat16),
            jax.ShapeDtypeStruct((N, T, 8, c4), jnp.float32),
        ),
        scratch_shapes=[pltpu.VMEM((th + 2, W + 2, cin_p), jnp.bfloat16)],
        compiler_params=pltpu.CompilerParams(
            dimension_semantics=("parallel", "parallel"),
            vmem_limit_bytes=int(vmem_limit)),
    )(x, w_taps)

    # Training-mode BatchNorm2d: biased batch statistics over (N, 2H, 2W),
    # reduced from the packed per-tile f32 partial sums.
    # TODO(synk): for very large N*H*W switch to a centered/Welford reduction;
    # E[x^2]-mean^2 in f32 (clamped at 0) is adequate at these magnitudes.
    count = N * 4 * H * W                       # = N * (2H) * (2W)
    sum_c = jnp.sum(stats[:, :, 0, :], axis=(0, 1)).reshape(4, cp)[:, :Cout].sum(0)
    ssq_c = jnp.sum(stats[:, :, 1, :], axis=(0, 1)).reshape(4, cp)[:, :Cout].sum(0)
    mean = sum_c / count
    var = jnp.maximum(ssq_c / count - mean * mean, 0.0)
    scale = gamma / jnp.sqrt(var + eps)
    shift = beta - mean * scale

    # TODO(synk): BN affine + LeakyReLU + parity de-interleave + NHWC->NCHW is
    # left to ONE fused XLA pass (perf-review option 7a): y is written once
    # (bf16) and read once; an in-kernel NCHW store would need a lane<->sublane
    # transpose of the channel axis inside the kernel.
    z = y.reshape(N, H, W, 2, 2, cp)[..., :Cout].astype(jnp.float32)
    z = z * scale + shift
    z = jnp.where(z > 0, z, slope * z)
    out = z.transpose(0, 5, 1, 3, 2, 4).reshape(N, Cout, 2 * H, 2 * W)
    return out


def _reference(x, weight, gamma, beta, eps, slope):
    """Plain-JAX reference matching the PyTorch module semantics (NCHW)."""
    N, Cin, H, W = x.shape
    Cout = weight.shape[1]
    full = jnp.zeros((N, Cout, 2 * H + 2, 2 * W + 2), jnp.float32)
    for kh in range(4):
        for kw in range(4):
            contrib = jnp.einsum('nihw,io->nohw', x, weight[:, :, kh, kw])
            full = full.at[:, :, kh:kh + 2 * H:2, kw:kw + 2 * W:2].add(contrib)
    z = full[:, :, 1:-1, 1:-1]
    mean = jnp.mean(z, axis=(0, 2, 3))
    var = jnp.var(z, axis=(0, 2, 3))
    zn = (z - mean[None, :, None, None]) / jnp.sqrt(var + eps)[None, :, None, None]
    zn = zn * gamma[None, :, None, None] + beta[None, :, None, None]
    return jnp.where(zn > 0, zn, slope * zn)


if __name__ == "__main__":
    key = jax.random.PRNGKey(0)
    k1, k2, k3, k4 = jax.random.split(key, 4)

    N, Cin, Cout, H, W = 2, 4, 8, 16, 16
    x = jax.random.normal(k1, (N, Cin, H, W), jnp.float32)
    # PyTorch ConvTranspose2d weight layout: (in_channels, out_channels, kH, kW)
    weight = 0.1 * jax.random.normal(k2, (Cin, Cout, 4, 4), jnp.float32)
    gamma = 1.0 + 0.1 * jax.random.normal(k3, (Cout,), jnp.float32)
    beta = 0.1 * jax.random.normal(k4, (Cout,), jnp.float32)

    # row_block=8 -> grid (2, 2): exercises the new spatial tiling + halo path.
    fwd = jax.jit(functools.partial(conv_transpose_block_2d, row_block=8))
    out = jax.block_until_ready(fwd(x, weight, gamma, beta))
    assert out.shape == (N, Cout, 2 * H, 2 * W), out.shape

    # bf16 matmul operands + bf16 conv->BN intermediate (f32 statistics):
    # compare against a reference with bf16-rounded inputs at a tolerance that
    # covers the extra bf16 rounding of the intermediate, plus a loose sanity
    # check against the full-precision module.
    x_bf = x.astype(jnp.bfloat16).astype(jnp.float32)
    w_bf = weight.astype(jnp.bfloat16).astype(jnp.float32)
    ref_bf = _reference(x_bf, w_bf, gamma, beta, 1e-5, 0.2)
    np.testing.assert_allclose(np.asarray(out), np.asarray(ref_bf),
                               rtol=3e-2, atol=3e-2)
    ref_fp = _reference(x, weight, gamma, beta, 1e-5, 0.2)
    np.testing.assert_allclose(np.asarray(out), np.asarray(ref_fp),
                               rtol=1e-1, atol=1e-1)
    print("KERNEL_OK")
</pallas_src>

<mosaic_0001>
module attributes {stable_mosaic.version = 11 : i64} {
  func.func @_conv_transpose_kernel(%arg0: i32, %arg1: i32, %arg2: memref<1x16x16x8xbf16, #tpu.memory_space<vmem>>, %arg3: memref<9x8x128xbf16, #tpu.memory_space<vmem>>, %arg4: memref<1x128x128xbf16, #tpu.memory_space<vmem>>, %arg5: memref<1x1x8x128xf32, #tpu.memory_space<vmem>>, %arg6: memref<10x18x8xbf16, #tpu.memory_space<vmem>>) attributes {dimension_semantics = [#tpu.dimension_semantics<parallel>, #tpu.dimension_semantics<parallel>], iteration_bounds = array<i64: 2, 2>, scalar_prefetch = 0 : i64, scratch_operands = 1 : i64, tpu.core_type = #tpu.core_type<tc>, window_params = [{transform_indices = @transform_0, window_bounds = array<i64: 1, 16, 16, 8>}, {pipeline_mode = #tpu.pipeline_mode<synchronous>, transform_indices = @transform_1, window_bounds = array<i64: 9, 8, 128>}, {transform_indices = @transform_2, window_bounds = array<i64: 1, 128, 128>}, {transform_indices = @transform_3, window_bounds = array<i64: 1, 1, 8, 128>}]} {
    %c8_i32 = arith.constant 8 : i32
    %0 = arith.muli %arg1, %c8_i32 : i32
    %c0 = arith.constant 0 : index
    %1 = arith.index_cast %0 : i32 to index
    %c0_0 = arith.constant 0 : index
    %c0_1 = arith.constant 0 : index
    %2 = vector.load %arg2[%c0, %1, %c0_0, %c0_1] : memref<1x16x16x8xbf16, #tpu.memory_space<vmem>>, vector<1x8x16x8xbf16>
    %3 = vector.shape_cast %2 : vector<1x8x16x8xbf16> to vector<8x16x8xbf16>
    %c1 = arith.constant 1 : index
    %c1_2 = arith.constant 1 : index
    %c0_3 = arith.constant 0 : index
    %4 = vector.load %arg6[%c1, %c1_2, %c0_3] : memref<10x18x8xbf16, #tpu.memory_space<vmem>>, vector<8x16x8xbf16>
    tpu.vector_store %arg6[%c1, %c1_2, %c0_3], %3 {strides = array<i32>} : memref<10x18x8xbf16, #tpu.memory_space<vmem>>, vector<8x16x8xbf16>,
    %cst = arith.constant 0.000000e+00 : bf16
    %5 = vector.broadcast %cst : bf16 to vector<10x1x8xbf16>
    %c0_4 = arith.constant 0 : index
    %c0_5 = arith.constant 0 : index
    %c0_6 = arith.constant 0 : index
    %6 = vector.load %arg6[%c0_4, %c0_5, %c0_6] : memref<10x18x8xbf16, #tpu.memory_space<vmem>>, vector<10x1x8xbf16>
    tpu.vector_store %arg6[%c0_4, %c0_5, %c0_6], %5 {strides = array<i32>} : memref<10x18x8xbf16, #tpu.memory_space<vmem>>, vector<10x1x8xbf16>,
    %cst_7 = arith.constant 0.000000e+00 : bf16
    %7 = vector.broadcast %cst_7 : bf16 to vector<10x1x8xbf16>
    %c0_8 = arith.constant 0 : index
    %c17 = arith.constant 17 : index
    %c0_9 = arith.constant 0 : index
    %8 = vector.load %arg6[%c0_8, %c17, %c0_9] : memref<10x18x8xbf16, #tpu.memory_space<vmem>>, vector<10x1x8xbf16>
    tpu.vector_store %arg6[%c0_8, %c17, %c0_9], %7 {strides = array<i32>} : memref<10x18x8xbf16, #tpu.memory_space<vmem>>, vector<10x1x8xbf16>,
    %c0_i32 = arith.constant 0 : i32
    %9 = arith.cmpi eq, %arg1, %c0_i32 : i32
    %10 = arith.extui %9 : i1 to i32
    %c0_i32_10 = arith.constant 0 : i32
    %11 = arith.cmpi ne, %10, %c0_i32_10 : i32
    scf.if %11 {
      %cst_90 = arith.constant 0.000000e+00 : bf16
      %91 = vector.broadcast %cst_90 : bf16 to vector<1x16x8xbf16>
      %c0_91 = arith.constant 0 : index
      %c1_92 = arith.constant 1 : index
      %c0_93 = arith.constant 0 : index
      %92 = vector.load %arg6[%c0_91, %c1_92, %c0_93] : memref<10x18x8xbf16, #tpu.memory_space<vmem>>, vector<1x16x8xbf16>
      tpu.vector_store %arg6[%c0_91, %c1_92, %c0_93], %91 {strides = array<i32>} : memref<10x18x8xbf16, #tpu.memory_space<vmem>>, vector<1x16x8xbf16>,
    } else {
    }
    %c0_i32_11 = arith.constant 0 : i32
    %12 = arith.cmpi sgt, %arg1, %c0_i32_11 : i32
    %13 = arith.extui %12 : i1 to i32
    %c0_i32_12 = arith.constant 0 : i32
    %14 = arith.cmpi ne, %13, %c0_i32_12 : i32
    scf.if %14 {
      %c1_i32_90 = arith.constant 1 : i32
      %91 = arith.subi %0, %c1_i32_90 : i32
      %c0_91 = arith.constant 0 : index
      %92 = arith.index_cast %91 : i32 to index
      %c0_92 = arith.constant 0 : index
      %c0_93 = arith.constant 0 : index
      %93 = vector.load %arg2[%c0_91, %92, %c0_92, %c0_93] : memref<1x16x16x8xbf16, #tpu.memory_space<vmem>>, vector<1x1x16x8xbf16>
      %94 = vector.shape_cast %93 : vector<1x1x16x8xbf16> to vector<1x16x8xbf16>
      %c0_94 = arith.constant 0 : index
      %c1_95 = arith.constant 1 : index
      %c0_96 = arith.constant 0 : index
      %95 = vector.load %arg6[%c0_94, %c1_95, %c0_96] : memref<10x18x8xbf16, #tpu.memory_space<vmem>>, vector<1x16x8xbf16>
      tpu.vector_store %arg6[%c0_94, %c1_95, %c0_96], %94 {strides = array<i32>} : memref<10x18x8xbf16, #tpu.memory_space<vmem>>, vector<1x16x8xbf16>,
    } else {
    }
    %c1_i32 = arith.constant 1 : i32
    %15 = arith.cmpi eq, %arg1, %c1_i32 : i32
    %16 = arith.extui %15 : i1 to i32
    %c0_i32_13 = arith.constant 0 : i32
    %17 = arith.cmpi ne, %16, %c0_i32_13 : i32
    scf.if %17 {
      %cst_90 = arith.constant 0.000000e+00 : bf16
      %91 = vector.broadcast %cst_90 : bf16 to vector<1x16x8xbf16>
      %c9 = arith.constant 9 : index
      %c1_91 = arith.constant 1 : index
      %c0_92 = arith.constant 0 : index
      %92 = vector.load %arg6[%c9, %c1_91, %c0_92] : memref<10x18x8xbf16, #tpu.memory_space<vmem>>, vector<1x16x8xbf16>
      tpu.vector_store %arg6[%c9, %c1_91, %c0_92], %91 {strides = array<i32>} : memref<10x18x8xbf16, #tpu.memory_space<vmem>>, vector<1x16x8xbf16>,
    } else {
    }
    %c1_i32_14 = arith.constant 1 : i32
    %18 = arith.cmpi slt, %arg1, %c1_i32_14 : i32
    %19 = arith.extui %18 : i1 to i32
    %c0_i32_15 = arith.constant 0 : i32
    %20 = arith.cmpi ne, %19, %c0_i32_15 : i32
    scf.if %20 {
      %c8_i32_90 = arith.constant 8 : i32
      %91 = arith.addi %0, %c8_i32_90 : i32
      %c0_91 = arith.constant 0 : index
      %92 = arith.index_cast %91 : i32 to index
      %c0_92 = arith.constant 0 : index
      %c0_93 = arith.constant 0 : index
      %93 = vector.load %arg2[%c0_91, %92, %c0_92, %c0_93] : memref<1x16x16x8xbf16, #tpu.memory_space<vmem>>, vector<1x1x16x8xbf16>
      %94 = vector.shape_cast %93 : vector<1x1x16x8xbf16> to vector<1x16x8xbf16>
      %c9 = arith.constant 9 : index
      %c1_94 = arith.constant 1 : index
      %c0_95 = arith.constant 0 : index
      %95 = vector.load %arg6[%c9, %c1_94, %c0_95] : memref<10x18x8xbf16, #tpu.memory_space<vmem>>, vector<1x16x8xbf16>
      tpu.vector_store %arg6[%c9, %c1_94, %c0_95], %94 {strides = array<i32>} : memref<10x18x8xbf16, #tpu.memory_space<vmem>>, vector<1x16x8xbf16>,
    } else {
    }
    %c0_16 = arith.constant 0 : index
    %c0_17 = arith.constant 0 : index
    %c0_18 = arith.constant 0 : index
    %21 = vector.load %arg6[%c0_16, %c0_17, %c0_18] : memref<10x18x8xbf16, #tpu.memory_space<vmem>>, vector<8x16x8xbf16>
    %22 = vector.shape_cast %21 : vector<8x16x8xbf16> to vector<128x8xbf16>
    %c0_19 = arith.constant 0 : index
    %c0_20 = arith.constant 0 : index
    %c0_21 = arith.constant 0 : index
    %23 = vector.load %arg3[%c0_19, %c0_20, %c0_21] : memref<9x8x128xbf16, #tpu.memory_space<vmem>>, vector<1x8x128xbf16>
    %24 = vector.shape_cast %23 : vector<1x8x128xbf16> to vector<8x128xbf16>
    %cst_22 = arith.constant dense<0.000000e+00> : vector<128x128xf32>
    %25 = tpu.matmul %22, %24, %cst_22 {dimension_numbers = #tpu.dot_dimension_numbers<[1], [0], [0], [1], [0, 0, 1, 1], [], []>} : vector<128x8xbf16>, vector<8x128xbf16>, vector<128x128xf32> -> vector<128x128xf32>
    %c0_23 = arith.constant 0 : index
    %c1_24 = arith.constant 1 : index
    %c0_25 = arith.constant 0 : index
    %26 = vector.load %arg6[%c0_23, %c1_24, %c0_25] : memref<10x18x8xbf16, #tpu.memory_space<vmem>>, vector<8x16x8xbf16>
    %27 = vector.shape_cast %26 : vector<8x16x8xbf16> to vector<128x8xbf16>
    %c1_26 = arith.constant 1 : index
    %c0_27 = arith.constant 0 : index
    %c0_28 = arith.constant 0 : index
    %28 = vector.load %arg3[%c1_26, %c0_27, %c0_28] : memref<9x8x128xbf16, #tpu.memory_space<vmem>>, vector<1x8x128xbf16>
    %29 = vector.shape_cast %28 : vector<1x8x128xbf16> to vector<8x128xbf16>
    %cst_29 = arith.constant dense<0.000000e+00> : vector<128x128xf32>
    %30 = tpu.matmul %27, %29, %cst_29 {dimension_numbers = #tpu.dot_dimension_numbers<[1], [0], [0], [1], [0, 0, 1, 1], [], []>} : vector<128x8xbf16>, vector<8x128xbf16>, vector<128x128xf32> -> vector<128x128xf32>
    %31 = arith.addf %25, %30 : vector<128x128xf32>
    %c0_30 = arith.constant 0 : index
    %c2 = arith.constant 2 : index
    %c0_31 = arith.constant 0 : index
    %32 = vector.load %arg6[%c0_30, %c2, %c0_31] : memref<10x18x8xbf16, #tpu.memory_space<vmem>>, vector<8x16x8xbf16>
    %33 = vector.shape_cast %32 : vector<8x16x8xbf16> to vector<128x8xbf16>
    %c2_32 = arith.constant 2 : index
    %c0_33 = arith.constant 0 : index
    %c0_34 = arith.constant 0 : index
    %34 = vector.load %arg3[%c2_32, %c0_33, %c0_34] : memref<9x8x128xbf16, #tpu.memory_space<vmem>>, vector<1x8x128xbf16>
    %35 = vector.shape_cast %34 : vector<1x8x128xbf16> to vector<8x128xbf16>
    %cst_35 = arith.constant dense<0.000000e+00> : vector<128x128xf32>
    %36 = tpu.matmul %33, %35, %cst_35 {dimension_numbers = #tpu.dot_dimension_numbers<[1], [0], [0], [1], [0, 0, 1, 1], [], []>} : vector<128x8xbf16>, vector<8x128xbf16>, vector<128x128xf32> -> vector<128x128xf32>
    %37 = arith.addf %31, %36 : vector<128x128xf32>
    %c1_36 = arith.constant 1 : index
    %c0_37 = arith.constant 0 : index
    %c0_38 = arith.constant 0 : index
    %38 = vector.load %arg6[%c1_36, %c0_37, %c0_38] : memref<10x18x8xbf16, #tpu.memory_space<vmem>>, vector<8x16x8xbf16>
    %39 = vector.shape_cast %38 : vector<8x16x8xbf16> to vector<128x8xbf16>
    %c3 = arith.constant 3 : index
    %c0_39 = arith.constant 0 : index
    %c0_40 = arith.constant 0 : index
    %40 = vector.load %arg3[%c3, %c0_39, %c0_40] : memref<9x8x128xbf16, #tpu.memory_space<vmem>>, vector<1x8x128xbf16>
    %41 = vector.shape_cast %40 : vector<1x8x128xbf16> to vector<8x128xbf16>
    %cst_41 = arith.constant dense<0.000000e+00> : vector<128x128xf32>
    %42 = tpu.matmul %39, %41, %cst_41 {dimension_numbers = #tpu.dot_dimension_numbers<[1], [0], [0], [1], [0, 0, 1, 1], [], []>} : vector<128x8xbf16>, vector<8x128xbf16>, vector<128x128xf32> -> vector<128x128xf32>
    %43 = arith.addf %37, %42 : vector<128x128xf32>
    %c1_42 = arith.constant 1 : index
    %c1_43 = arith.constant 1 : index
    %c0_44 = arith.constant 0 : index
    %44 = vector.load %arg6[%c1_42, %c1_43, %c0_44] : memref<10x18x8xbf16, #tpu.memory_space<vmem>>, vector<8x16x8xbf16>
    %45 = vector.shape_cast %44 : vector<8x16x8xbf16> to vector<128x8xbf16>
    %c4 = arith.constant 4 : index
    %c0_45 = arith.constant 0 : index
    %c0_46 = arith.constant 0 : index
    %46 = vector.load %arg3[%c4, %c0_45, %c0_46] : memref<9x8x128xbf16, #tpu.memory_space<vmem>>, vector<1x8x128xbf16>
    %47 = vector.shape_cast %46 : vector<1x8x128xbf16> to vector<8x128xbf16>
    %cst_47 = arith.constant dense<0.000000e+00> : vector<128x128xf32>
    %48 = tpu.matmul %45, %47, %cst_47 {dimension_numbers = #tpu.dot_dimension_numbers<[1], [0], [0], [1], [0, 0, 1, 1], [], []>} : vector<128x8xbf16>, vector<8x128xbf16>, vector<128x128xf32> -> vector<128x128xf32>
    %49 = arith.addf %43, %48 : vector<128x128xf32>
    %c1_48 = arith.constant 1 : index
    %c2_49 = arith.constant 2 : index
    %c0_50 = arith.constant 0 : index
    %50 = vector.load %arg6[%c1_48, %c2_49, %c0_50] : memref<10x18x8xbf16, #tpu.memory_space<vmem>>, vector<8x16x8xbf16>
    %51 = vector.shape_cast %50 : vector<8x16x8xbf16> to vector<128x8xbf16>
    %c5 = arith.constant 5 : index
    %c0_51 = arith.constant 0 : index
    %c0_52 = arith.constant 0 : index
    %52 = vector.load %arg3[%c5, %c0_51, %c0_52] : memref<9x8x128xbf16, #tpu.memory_space<vmem>>, vector<1x8x128xbf16>
    %53 = vector.shape_cast %52 : vector<1x8x128xbf16> to vector<8x128xbf16>
    %cst_53 = arith.constant dense<0.000000e+00> : vector<128x128xf32>
    %54 = tpu.matmul %51, %53, %cst_53 {dimension_numbers = #tpu.dot_dimension_numbers<[1], [0], [0], [1], [0, 0, 1, 1], [], []>} : vector<128x8xbf16>, vector<8x128xbf16>, vector<128x128xf32> -> vector<128x128xf32>
    %55 = arith.addf %49, %54 : vector<128x128xf32>
    %c2_54 = arith.constant 2 : index
    %c0_55 = arith.constant 0 : index
    %c0_56 = arith.constant 0 : index
    %56 = vector.load %arg6[%c2_54, %c0_55, %c0_56] : memref<10x18x8xbf16, #tpu.memory_space<vmem>>, vector<8x16x8xbf16>
    %57 = vector.shape_cast %56 : vector<8x16x8xbf16> to vector<128x8xbf16>
    %c6 = arith.constant 6 : index
    %c0_57 = arith.constant 0 : index
    %c0_58 = arith.constant 0 : index
    %58 = vector.load %arg3[%c6, %c0_57, %c0_58] : memref<9x8x128xbf16, #tpu.memory_space<vmem>>, vector<1x8x128xbf16>
    %59 = vector.shape_cast %58 : vector<1x8x128xbf16> to vector<8x128xbf16>
    %cst_59 = arith.constant dense<0.000000e+00> : vector<128x128xf32>
    %60 = tpu.matmul %57, %59, %cst_59 {dimension_numbers = #tpu.dot_dimension_numbers<[1], [0], [0], [1], [0, 0, 1, 1], [], []>} : vector<128x8xbf16>, vector<8x128xbf16>, vector<128x128xf32> -> vector<128x128xf32>
    %61 = arith.addf %55, %60 : vector<128x128xf32>
    %c2_60 = arith.constant 2 : index
    %c1_61 = arith.constant 1 : index
    %c0_62 = arith.constant 0 : index
    %62 = vector.load %arg6[%c2_60, %c1_61, %c0_62] : memref<10x18x8xbf16, #tpu.memory_space<vmem>>, vector<8x16x8xbf16>
    %63 = vector.shape_cast %62 : vector<8x16x8xbf16> to vector<128x8xbf16>
    %c7 = arith.constant 7 : index
    %c0_63 = arith.constant 0 : index
    %c0_64 = arith.constant 0 : index
    %64 = vector.load %arg3[%c7, %c0_63, %c0_64] : memref<9x8x128xbf16, #tpu.memory_space<vmem>>, vector<1x8x128xbf16>
    %65 = vector.shape_cast %64 : vector<1x8x128xbf16> to vector<8x128xbf16>
    %cst_65 = arith.constant dense<0.000000e+00> : vector<128x128xf32>
    %66 = tpu.matmul %63, %65, %cst_65 {dimension_numbers = #tpu.dot_dimension_numbers<[1], [0], [0], [1], [0, 0, 1, 1], [], []>} : vector<128x8xbf16>, vector<8x128xbf16>, vector<128x128xf32> -> vector<128x128xf32>
    %67 = arith.addf %61, %66 : vector<128x128xf32>
    %c2_66 = arith.constant 2 : index
    %c2_67 = arith.constant 2 : index
    %c0_68 = arith.constant 0 : index
    %68 = vector.load %arg6[%c2_66, %c2_67, %c0_68] : memref<10x18x8xbf16, #tpu.memory_space<vmem>>, vector<8x16x8xbf16>
    %69 = vector.shape_cast %68 : vector<8x16x8xbf16> to vector<128x8xbf16>
    %c8 = arith.constant 8 : index
    %c0_69 = arith.constant 0 : index
    %c0_70 = arith.constant 0 : index
    %70 = vector.load %arg3[%c8, %c0_69, %c0_70] : memref<9x8x128xbf16, #tpu.memory_space<vmem>>, vector<1x8x128xbf16>
    %71 = vector.shape_cast %70 : vector<1x8x128xbf16> to vector<8x128xbf16>
    %cst_71 = arith.constant dense<0.000000e+00> : vector<128x128xf32>
    %72 = tpu.matmul %69, %71, %cst_71 {dimension_numbers = #tpu.dot_dimension_numbers<[1], [0], [0], [1], [0, 0, 1, 1], [], []>} : vector<128x8xbf16>, vector<8x128xbf16>, vector<128x128xf32> -> vector<128x128xf32>
    %73 = arith.addf %67, %72 : vector<128x128xf32>
    %74 = arith.truncf %73 : vector<128x128xf32> to vector<128x128xbf16>
    %c0_72 = arith.constant 0 : index
    %c0_73 = arith.constant 0 : index
    %c0_74 = arith.constant 0 : index
    %75 = vector.load %arg4[%c0_72, %c0_73, %c0_74] : memref<1x128x128xbf16, #tpu.memory_space<vmem>>, vector<1x128x128xbf16>
    %76 = vector.shape_cast %75 : vector<1x128x128xbf16> to vector<128x128xbf16>
    %77 = vector.shape_cast %74 : vector<128x128xbf16> to vector<1x128x128xbf16>
    tpu.vector_store %arg4[%c0_72, %c0_73, %c0_74], %77 {strides = array<i32>} : memref<1x128x128xbf16, #tpu.memory_space<vmem>>, vector<1x128x128xbf16>,
    %cst_75 = arith.constant 0.000000e+00 : f32
    %78 = vector.broadcast %cst_75 : f32 to vector<1x1x8x128xf32>
    %c0_76 = arith.constant 0 : index
    %c0_77 = arith.constant 0 : index
    %c0_78 = arith.constant 0 : index
    %c0_79 = arith.constant 0 : index
    %79 = vector.load %arg5[%c0_76, %c0_77, %c0_78, %c0_79] : memref<1x1x8x128xf32, #tpu.memory_space<vmem>>, vector<1x1x8x128xf32>
    tpu.vector_store %arg5[%c0_76, %c0_77, %c0_78, %c0_79], %78 {strides = array<i32>} : memref<1x1x8x128xf32, #tpu.memory_space<vmem>>, vector<1x1x8x128xf32>,
    %cst_80 = arith.constant dense<0.000000e+00> : vector<128xf32>
    %80 = vector.multi_reduction <add>, %73, %cst_80 [0] : vector<128x128xf32> to vector<128xf32>
    %81 = vector.shape_cast %80 : vector<128xf32> to vector<1x128xf32>
    %c0_81 = arith.constant 0 : index
    %c0_82 = arith.constant 0 : index
    %c0_83 = arith.constant 0 : index
    %c0_84 = arith.constant 0 : index
    %82 = vector.load %arg5[%c0_81, %c0_82, %c0_83, %c0_84] : memref<1x1x8x128xf32, #tpu.memory_space<vmem>>, vector<1x1x1x128xf32>
    %83 = vector.shape_cast %82 : vector<1x1x1x128xf32> to vector<1x128xf32>
    %84 = vector.shape_cast %81 : vector<1x128xf32> to vector<1x1x1x128xf32>
    tpu.vector_store %arg5[%c0_81, %c0_82, %c0_83, %c0_84], %84 {strides = array<i32>} : memref<1x1x8x128xf32, #tpu.memory_space<vmem>>, vector<1x1x1x128xf32>,
    %85 = arith.mulf %73, %73 : vector<128x128xf32>
    %cst_85 = arith.constant dense<0.000000e+00> : vector<128xf32>
    %86 = vector.multi_reduction <add>, %85, %cst_85 [0] : vector<128x128xf32> to vector<128xf32>
    %87 = vector.shape_cast %86 : vector<128xf32> to vector<1x128xf32>
    %c0_86 = arith.constant 0 : index
    %c0_87 = arith.constant 0 : index
    %c1_88 = arith.constant 1 : index
    %c0_89 = arith.constant 0 : index
    %88 = vector.load %arg5[%c0_86, %c0_87, %c1_88, %c0_89] : memref<1x1x8x128xf32, #tpu.memory_space<vmem>>, vector<1x1x1x128xf32>
    %89 = vector.shape_cast %88 : vector<1x1x1x128xf32> to vector<1x128xf32>
    %90 = vector.shape_cast %87 : vector<1x128xf32> to vector<1x1x1x128xf32>
    tpu.vector_store %arg5[%c0_86, %c0_87, %c1_88, %c0_89], %90 {strides = array<i32>} : memref<1x1x8x128xf32, #tpu.memory_space<vmem>>, vector<1x1x1x128xf32>,
    return
  }
  func.func @transform_0(%arg0: i32, %arg1: i32) -> (i32, i32, i32, i32) {
    %c0_i32 = arith.constant 0 : i32
    %c0_i32_0 = arith.constant 0 : i32
    %c0_i32_1 = arith.constant 0 : i32
    %c0_i32_2 = arith.constant 0 : i32
    return %arg0, %c0_i32, %c0_i32_0, %c0_i32_1 : i32, i32, i32, i32
  }
  func.func @transform_1(%arg0: i32, %arg1: i32) -> (i32, i32, i32) {
    %c0_i32 = arith.constant 0 : i32
    %c0_i32_0 = arith.constant 0 : i32
    %c0_i32_1 = arith.constant 0 : i32
    %c0_i32_2 = arith.constant 0 : i32
    return %c0_i32, %c0_i32_0, %c0_i32_1 : i32, i32, i32
  }
  func.func @transform_2(%arg0: i32, %arg1: i32) -> (i32, i32, i32) {
    %c0_i32 = arith.constant 0 : i32
    %c0_i32_0 = arith.constant 0 : i32
    return %arg0, %arg1, %c0_i32 : i32, i32, i32
  }
  func.func @transform_3(%arg0: i32, %arg1: i32) -> (i32, i32, i32, i32) {
    %c0_i32 = arith.constant 0 : i32
    %c0_i32_0 = arith.constant 0 : i32
    %c0_i32_1 = arith.constant 0 : i32
    return %arg0, %arg1, %c0_i32, %c0_i32_0 : i32, i32, i32, i32
  }
}

</mosaic_0001>

<bundles_post_ra>
// kernel: conv_transpose_block_2d.1
= control target key start
LH: loop header
LB: loop body
LE: loop exit
PB: predicated region body
PF: predicated region fallthrough
CT: control target
= control target key end

     0   :  { %s4157_s12 = smov 0   ;;  %s4159_s13 = smov 0   ;;  %s5242_s0 = inlined_call_operand.vmem [shape: bf16[2,16,16,8], index: 0, kind: input, shape index: {}]   ;;  %s5243_s1 = inlined_call_operand.vmem [shape: bf16[9,8,128], index: 1, kind: input, shape index: {}]   ;;  %s5244_s2 = inlined_call_operand.vmem [shape: bf16[2,256,128], index: 2, kind: output, shape index: {0}]   ;;  %s5245_s3 = inlined_call_operand.vmem [shape: f32[2,2,8,128], index: 3, kind: output, shape index: {1}]  }
   0x1   :  { %s4161_s14 = smov 0   ;;  %s4163_s15 = smov 0  }
   0x2   :  { %s4165_s16 = smov 0  }
   0x3 LB: > { %s23_s17 = sadd.s32 1, %s4124_s14  ;;  %s26_s18 = sadd.s32 1, %s4128_s15  ;;  %s4132_s16 = sphi %s4165_s16, %s14_s16   ;;  %s4128_s15 = sphi %s4163_s15, %s5278_s15   ;;  %s4124_s14 = sphi %s4161_s14, %s5277_s14   ;;  %s4120_s13 = sphi %s4159_s13, %s5276_s13   ;;  %s4116_s12 = sphi %s4157_s12, %s5275_s12  }
   0x4   : > { %p24_p0 = scmp.ge.s32.totalorder %s23_s17, 2  ;;  %p3359_p1 = scmp.ge.s32.totalorder %s4132_s16, 1 }
   0x5   : > { %p156_p2 = scmp.lt.s32.totalorder %s4132_s16, 5 }
   0x6   : > { %s5280_s17 = smov (%p24_p0, %s23_s17), 0  ;;  %s5282_s18 = smov (!%p24_p0, %s26_s18), %s4128_s15 }
   0x7   : > { %p157_p3 = pnand %p3359_p1, %p156_p2  ;;  %p28_p4 = scmp.ge.s32.totalorder %s5282_s18, 2 }
   0x9   : > { %s5284_s18 = smov (%p28_p4, %s5282_s18), 0  ;;  %160 = sbr.rel (%p157_p3) target bundleno = 524 (0x20c), region = 28 }
  0x10   : > { %p192_p5 = scmp.lt.s32.totalorder %s4120_s13, 1  ;;  %s3362_s19 = sshll.u32 %s4116_s12, 4  ;;  %vm236_vm0 = vsmask.f32 256  ;;  %vm408_vm1 = vcmask 57344   ;;  %vm400_vm3 = vcmask 60416  }
  0x11   : > { %p200_p6 = scmp.lt.s32.totalorder %s3362_s19, 31  ;;  %p209_p7 = scmp.lt.s32.totalorder %s4116_s12, 1  ;;  %vm4206_vm2 = vmand %vm408_vm1, %vm236_vm0  ;;  %v462_v1 = vld [vmem:[#allocation2] sm:$0x1]  ;;  %vm401_vm4 = vsmask.f32 7938 }
  0x12   : > { %s5286_s13 = smov (!%p192_p5, %s4120_s13), 1  ;;  %s3367_s4 = sshll.u32 %s4116_s12, 3  ;;  %v463_v2 = vsel %vm4206_vm2, 0, %v462_v1  ;;  %v489_v3 = vld [vmem:[#allocation2 + $0x6c] sm:$0x1]  ;;  %vm4243_vm5 = vmand %vm400_vm3, %vm401_vm4 }
  0x13   : > { %s5288_s19 = smov (!%p200_p6, %s3362_s19), 31  ;;  %s3575_s20 = sshll.u32 %s5286_s13, 7  ;;  %464 = vst [vmem:[#allocation2] sm:$0x1] %v463_v2  ;;  %v490_v6 = vsel %vm4206_vm2, 0, %v489_v3  ;;  %vm4390_vm8 = vmand %vm408_vm1, %vm401_vm4 }
  0x14   : > { %s3363_s21 = sshll.u32 %s5286_s13, 5  ;;  %s4194_s24 = scalar_lea.vmem %s5242_s0, %s3575_s20  ;;  %491 = vst [vmem:[#allocation2 + $0x6c] sm:$0x1] %v490_v6  ;;  %v403_v12 = vld [vmem:[#allocation2 + $0xc] sm:$0xf] }
  0x15   : > { %s203_s25 = sadd.s32 %s3363_s21, %s5288_s19  ;;  %s3365_s27 = sshll.u32 %s5286_s13, 1  ;;  %v410_v13 = vld [vmem:[#allocation2 + $0x14] sm:$0x1]  ;;  %v413_v20 = vld [vmem:[#allocation2 + $0x18] sm:$0xf] }
  0x16   : > { %s3364_s26 = sshll.u32 %s203_s25, 2  ;;  %s3577_s6 = sshll.u32 %s4116_s12, 6  ;;  %v417_v26 = vld [vmem:[#allocation2 + $0x20] sm:$0x1]  ;;  %v420_v28 = vld [vmem:[#allocation2 + $0x24] sm:$0xf] }
  0x17   : > { %s4199_s30 = scalar_lea.vmem %s5244_s2, %s3364_s26  ;;  %s4211_s8 = scalar_lea.vmem %s4194_s24, %s3577_s6  ;;  %v424_v36 = vld [vmem:[#allocation2 + $0x2c] sm:$0x1]  ;;  %vm237_vm6 = vsmask.f32 4368  ;;  %v427_v56 = vld [vmem:[#allocation2 + $0x30] sm:$0xf] }
  0x18   : > { %s210_s5 = scalar_select %p209_p7, %s4116_s12, 1  ;;  %v220_v4 = vld [vmem:[%s4211_s8] sm:$0xf]  ;;  %v4217_v5 = vld [vmem:[%s4211_s8 + $0x4] sm:$0xf]  ;;  %vm4339_vm7 = vmor %vm236_vm0, %vm237_vm6 }
  0x19   : > { %v240_v7 = vshrl.u32 %v220_v4, 16  ;;  %v243_v8 = vshll.u32 %v220_v4, 16  ;;  %v248_v9 = vshrl.u32 %v4217_v5, 16  ;;  %v222_v10 = vld [vmem:[%s4211_s8 + $0x8] sm:$0xf]  ;;  %v251_v11 = vshll.u32 %v4217_v5, 16 }
  0x1a   : > { %s212_s7 = sadd.s32 %s3365_s27, %s210_s5  ;;  %v257_v14 = vshrl.u32 %v222_v10, 16  ;;  %v260_v15 = vshll.u32 %v222_v10, 16  ;;  %v4230_v16 = vld [vmem:[%s4211_s8 + $0xc] sm:$0xf]  ;;  %v224_v17 = vld [vmem:[%s4211_s8 + $0x10] sm:$0xf] }
  0x1b   : > { %s3366_s9 = sshll.u32 %s212_s7, 3  ;;  %v4233_v18 = vrot.slane %v240_v7, 7  ;;  %v4235_v19 = vrot.slane %v248_v9, 7  ;;  %v265_v21 = vshrl.u32 %v4230_v16, 16  ;;  %v274_v22 = vshrl.u32 %v224_v17, 16  ;;  %p3370_p8 = scmp.ne.s32.totalorder %s4116_s12, 0 }
  0x1c   : > { %s4224_s13 = scalar_lea.vmem %s5245_s3, %s3366_s9  ;;  %v4239_v23 = vld [vmem:[%s4211_s8 + $0x14] sm:$0xf]  ;;  %v4247_v25 = vrot.slane %v257_v14, 7  ;;  %v277_v27 = vshll.u32 %v224_v17, 16  ;;  %v226_v30 = vld [vmem:[%s4211_s8 + $0x18] sm:$0xf] }
  0x1d   : > { %v282_v29 = vshrl.u32 %v4239_v23, 16  ;;  %v268_v31 = vshll.u32 %v4230_v16, 16  ;;  %v245_v32 = vor.u32 %v243_v8, %v4233_v18  ;;  %v255_v33 = vrot.slane %v4235_v19, 4  ;;  %v4259_v37 = vld [vmem:[%s4211_s8 + $0x1c] sm:$0xf] }
  0x1e   : > { %v4254_v34 = vrot.slane %v265_v21, 7  ;;  %v4256_v35 = vrot.slane %v274_v22, 7  ;;  %v262_v38 = vor.u32 %v260_v15, %v4247_v25  ;;  %v291_v40 = vshrl.u32 %v226_v30, 16  ;;  %v228_v42 = vld [vmem:[%s4211_s8 + $0x20] sm:$0xf] }
  0x1f   : > { %v4262_v39 = vrot.slane %v282_v29, 7  ;;  %v294_v41 = vshll.u32 %v226_v30, 16  ;;  %v404_v43 = vsel %vm4243_vm5, %v245_v32, %v403_v12  ;;  %v411_v44 = vsel %vm4206_vm2, %v255_v33, %v410_v13  ;;  %v4272_v47 = vld [vmem:[%s4211_s8 + $0x24] sm:$0xf]  ;;  %v230_v48 = vld [vmem:[%s4211_s8 + $0x28] sm:$0xf] }
  0x20   : > { %v272_v45 = vrot.slane %v4254_v34, 4  ;;  %v279_v46 = vor.u32 %v277_v27, %v4256_v35  ;;  %405 = vst [vmem:[#allocation2 + $0xc] sm:$0xf] %v404_v43  ;;  %412 = vst [vmem:[#allocation2 + $0x14] sm:$0x1] %v411_v44  ;;  %v414_v49 = vsel %vm4243_vm5, %v262_v38, %v413_v20  ;;  %v4278_v51 = vrot.slane %v291_v40, 7 }
  0x21   : > { %v289_v50 = vrot.slane %v4262_v39, 4  ;;  %v299_v52 = vshrl.u32 %v4259_v37, 16  ;;  %v4282_v53 = vld [vmem:[%s4211_s8 + $0x2c] sm:$0xf]  ;;  %415 = vst [vmem:[#allocation2 + $0x18] sm:$0xf] %v414_v49 }
  0x22   : > { %v418_v54 = vsel %vm4206_vm2, %v272_v45, %v417_v26  ;;  %v421_v55 = vsel %vm4243_vm5, %v279_v46, %v420_v28  ;;  %v308_v57 = vshrl.u32 %v228_v42, 16  ;;  %v311_v58 = vshll.u32 %v228_v42, 16  ;;  %v232_v59 = vld [vmem:[%s4211_s8 + $0x30] sm:$0xf]  ;;  %v431_v63 = vld [vmem:[#allocation2 + $0x38] sm:$0x1] }
  0x23   : > { %419 = vst [vmem:[#allocation2 + $0x20] sm:$0x1] %v418_v54  ;;  %422 = vst [vmem:[#allocation2 + $0x24] sm:$0xf] %v421_v55  ;;  %v425_v60 = vsel %vm4206_vm2, %v289_v50, %v424_v36  ;;  %v296_v61 = vor.u32 %v294_v41, %v4278_v51  ;;  %v4292_v62 = vrot.slane %v299_v52, 7  ;;  %v316_v2 = vshrl.u32 %v4272_v47, 16 }
  0x24   : > { %v434_v1 = vld [vmem:[#allocation2 + $0x3c] sm:$0xf]  ;;  %426 = vst [vmem:[#allocation2 + $0x2c] sm:$0x1] %v425_v60  ;;  %v4295_v3 = vrot.slane %v308_v57, 7  ;;  %v325_v6 = vshrl.u32 %v230_v48, 16  ;;  %v253_v60 = vor.u32 %v251_v11, %v4235_v19 }
  0x25   : > { %v438_v4 = vld [vmem:[#allocation2 + $0x44] sm:$0x1]  ;;  %v328_v7 = vshll.u32 %v230_v48, 16  ;;  %v333_v8 = vshrl.u32 %v4282_v53, 16  ;;  %v4299_v9 = vld [vmem:[%s4211_s8 + $0x34] sm:$0xf]  ;;  %v428_v10 = vsel %vm4243_vm5, %v296_v61, %v427_v56 }
  0x26   : > { %v306_v12 = vrot.slane %v4292_v62, 4  ;;  %v4304_v13 = vrot.slane %v316_v2, 7  ;;  %v441_v14 = vld [vmem:[#allocation2 + $0x48] sm:$0xf]  ;;  %v342_v15 = vshrl.u32 %v232_v59, 16  ;;  %v313_v20 = vor.u32 %v311_v58, %v4295_v3 }
  0x27   : > { %v234_v17 = vld [vmem:[%s4211_s8 + $0x38] sm:$0xf]  ;;  %429 = vst [vmem:[#allocation2 + $0x30] sm:$0xf] %v428_v10  ;;  %v4308_v21 = vrot.slane %v325_v6, 7  ;;  %v4310_v22 = vrot.slane %v333_v8, 7  ;;  %v270_v2 = vor.u32 %v268_v31, %v4254_v34 }
  0x28   : > { %v445_v26 = vld [vmem:[#allocation2 + $0x50] sm:$0x1]  ;;  %v345_v27 = vshll.u32 %v232_v59, 16  ;;  %v432_v28 = vsel %vm4206_vm2, %v306_v12, %v431_v63  ;;  %v323_v29 = vrot.slane %v4304_v13, 4  ;;  %v4315_v30 = vrot.slane %v342_v15, 7 }
  0x29   : > { %v350_v32 = vshrl.u32 %v4299_v9, 16  ;;  %v4319_v33 = vld [vmem:[%s4211_s8 + $0x3c] sm:$0xf]  ;;  %433 = vst [vmem:[#allocation2 + $0x38] sm:$0x1] %v432_v28  ;;  %v435_v36 = vsel %vm4243_vm5, %v313_v20, %v434_v1  ;;  %v330_v38 = vor.u32 %v328_v7, %v4308_v21  ;;  %v340_v40 = vrot.slane %v4310_v22, 4 }
  0x2a   : > { %v448_v41 = vld [vmem:[#allocation2 + $0x54] sm:$0xf]  ;;  %v359_v42 = vshrl.u32 %v234_v17, 16  ;;  %436 = vst [vmem:[#allocation2 + $0x3c] sm:$0xf] %v435_v36  ;;  %v439_v43 = vsel %vm4206_vm2, %v323_v29, %v438_v4  ;;  %v347_v44 = vor.u32 %v345_v27, %v4315_v30  ;;  %v362_v46 = vshll.u32 %v234_v17, 16 }
  0x2b   : > { %v4328_v45 = vrot.slane %v350_v32, 7  ;;  %440 = vst [vmem:[#allocation2 + $0x44] sm:$0x1] %v439_v43  ;;  %v442_v48 = vsel %vm4243_vm5, %v330_v38, %v441_v14  ;;  %v446_v49 = vsel %vm4206_vm2, %v340_v40, %v445_v26  ;;  %v452_v50 = vld [vmem:[#allocation2 + $0x5c] sm:$0x1]  ;;  %v367_v54 = vshrl.u32 %v4319_v33, 16 }
  0x2c   : > { %v4334_v52 = vrot.slane %v359_v42, 7  ;;  %443 = vst [vmem:[#allocation2 + $0x48] sm:$0xf] %v442_v48  ;;  %447 = vst [vmem:[#allocation2 + $0x50] sm:$0x1] %v446_v49  ;;  %v449_v56 = vsel %vm4243_vm5, %v347_v44, %v448_v41  ;;  %v246_v59 = vrot.slane %v4233_v18, 4 }
  0x2d   : > { %v357_v57 = vrot.slane %v4328_v45, 4  ;;  %v455_v58 = vld [vmem:[#allocation2 + $0x60] sm:$0xf]  ;;  %450 = vst [vmem:[#allocation2 + $0x54] sm:$0xf] %v449_v56  ;;  %v369_v63 = vrot.slane %v367_v54, 7 }
  0x2e   : > { %v364_v61 = vor.u32 %v362_v46, %v4334_v52  ;;  %v263_v1 = vrot.slane %v4247_v25, 4  ;;  %v459_v6 = vld [vmem:[#allocation2 + $0x68] sm:$0x1]  ;;  %v254_v18 = vsel %vm4339_vm7, %v246_v59, %v253_v60  ;;  %v280_v5 = vrot.slane %v4256_v35, 4  ;;  %v465_v34 = vld [vmem:[#allocation2 + $0xc] sm:$0x1] }
  0x2f   : > { %v453_v4 = vsel %vm4206_vm2, %v357_v57, %v452_v50  ;;  %v285_v11 = vshll.u32 %v4239_v23, 16  ;;  %v374_v25 = vrot.slane %v369_v63, 4  ;;  %407 = vst.msk [vmem:[#allocation2 + $0x10] sm:$0xf] %vm400_vm3, %v254_v18  ;;  %v297_v31 = vrot.slane %v4278_v51, 4 }
  0x30   : > { %454 = vst [vmem:[#allocation2 + $0x5c] sm:$0x1] %v453_v4  ;;  %v456_v19 = vsel %vm4243_vm5, %v364_v61, %v455_v58  ;;  %v271_v16 = vsel %vm4339_vm7, %v263_v1, %v270_v2  ;;  %v302_v23 = vshll.u32 %v4259_v37, 16  ;;  %v314_v7 = vrot.slane %v4295_v3, 4  ;;  %v468_v10 = vld [vmem:[#allocation2 + $0x18] sm:$0x1] }
  0x31   : > { %457 = vst [vmem:[#allocation2 + $0x60] sm:$0xf] %v456_v19  ;;  %416 = vst.msk [vmem:[#allocation2 + $0x1c] sm:$0xf] %vm400_vm3, %v271_v16  ;;  %v287_v35 = vor.u32 %v285_v11, %v4262_v39  ;;  %v319_v8 = vshll.u32 %v4272_v47, 16  ;;  %v460_v12 = vsel %vm4206_vm2, %v374_v25, %v459_v6  ;;  %v331_v14 = vrot.slane %v4308_v21, 4 }
  0x32   : > { %v336_v51 = vshll.u32 %v4282_v53, 16  ;;  %v348_v15 = vrot.slane %v4315_v30, 4  ;;  %v471_v17 = vld [vmem:[#allocation2 + $0x24] sm:$0x1]  ;;  %461 = vst [vmem:[#allocation2 + $0x68] sm:$0x1] %v460_v12  ;;  %v304_v37 = vor.u32 %v302_v23, %v4292_v62 }
  0x33   : > { %v288_v39 = vsel %vm4339_vm7, %v280_v5, %v287_v35  ;;  %v321_v3 = vor.u32 %v319_v8, %v4304_v13  ;;  %v353_v47 = vshll.u32 %v4299_v9, 16  ;;  %v474_v20 = vld [vmem:[#allocation2 + $0x30] sm:$0x1]  ;;  %v477_v26 = vld [vmem:[#allocation2 + $0x3c] sm:$0x1]  ;;  %v365_v29 = vrot.slane %v4334_v52, 4 }
  0x34   : > { %v493_v27 = vld [vmem:[#allocation2 + $0x8] sm:$0x1]  ;;  %v496_v28 = vld [vmem:[#allocation2 + $0x14] sm:$0x1]  ;;  %v499_v21 = vld [vmem:[#allocation2 + $0x20] sm:$0x1]  ;;  %v338_v53 = vor.u32 %v336_v51, %v4310_v22  ;;  %v305_v36 = vsel %vm4339_vm7, %v297_v31, %v304_v37 }
  0x35   : > { %423 = vst.msk [vmem:[#allocation2 + $0x28] sm:$0xf] %vm400_vm3, %v288_v39  ;;  %v370_v30 = vshll.u32 %v4319_v33, 16  ;;  %v466_v62 = vsel %vm4206_vm2, 0, %v465_v34  ;;  %v480_v32 = vld [vmem:[#allocation2 + $0x48] sm:$0x1]  ;;  %v322_v22 = vsel %vm4339_vm7, %v314_v7, %v321_v3  ;;  %v355_v38 = vor.u32 %v353_v47, %v4328_v45 }
  0x36   : > { %v502_v13 = vld [vmem:[#allocation2 + $0x2c] sm:$0x1]  ;;  %467 = vst [vmem:[#allocation2 + $0xc] sm:$0x1] %v466_v62  ;;  %v469_v33 = vsel %vm4206_vm2, 0, %v468_v10  ;;  %v339_v43 = vsel %vm4339_vm7, %v331_v14, %v338_v53  ;;  %v472_v46 = vsel %vm4206_vm2, 0, %v471_v17 }
  0x37   : > { %v483_v40 = vld [vmem:[#allocation2 + $0x54] sm:$0x1]  ;;  %v505_v41 = vld [vmem:[#allocation2 + $0x38] sm:$0x1]  ;;  %430 = vst.msk [vmem:[#allocation2 + $0x34] sm:$0xf] %vm400_vm3, %v305_v36  ;;  %v372_v44 = vor.u32 %v370_v30, %v369_v63  ;;  %v356_v50 = vsel %vm4339_vm7, %v348_v15, %v355_v38 }
  0x38   : > { %v520_v42 = vld [vmem:[#allocation2 + $0x74] sm:$0x1]  ;;  %437 = vst.msk [vmem:[#allocation2 + $0x40] sm:$0xf] %vm400_vm3, %v322_v22  ;;  %470 = vst [vmem:[#allocation2 + $0x18] sm:$0x1] %v469_v33 }
  0x39   : > { %v475_v45 = vsel %vm4206_vm2, 0, %v474_v20  ;;  %v508_v48 = vld [vmem:[#allocation2 + $0x44] sm:$0x1]  ;;  %v511_v49 = vld [vmem:[#allocation2 + $0x50] sm:$0x1]  ;;  %v478_v52 = vsel %vm4206_vm2, 0, %v477_v26  ;;  %v373_v58 = vsel %vm4339_vm7, %v365_v29, %v372_v44 }
  0x3a   : > { %444 = vst.msk [vmem:[#allocation2 + $0x4c] sm:$0xf] %vm400_vm3, %v339_v43  ;;  %473 = vst [vmem:[#allocation2 + $0x24] sm:$0x1] %v472_v46  ;;  %v481_v54 = vsel %vm4206_vm2, 0, %v480_v32  ;;  %v484_v56 = vsel %vm4206_vm2, 0, %v483_v40 }
  0x3b   : > { %476 = vst [vmem:[#allocation2 + $0x30] sm:$0x1] %v475_v45  ;;  %v514_v57 = vld [vmem:[#allocation2 + $0x5c] sm:$0x1]  ;;  %451 = vst.msk [vmem:[#allocation2 + $0x58] sm:$0xf] %vm400_vm3, %v356_v50 }
  0x3c   : > { %479 = vst [vmem:[#allocation2 + $0x3c] sm:$0x1] %v478_v52  ;;  %482 = vst [vmem:[#allocation2 + $0x48] sm:$0x1] %v481_v54  ;;  %v486_v59 = vld [vmem:[#allocation2 + $0x60] sm:$0x1] }
  0x3d   : > { %485 = vst [vmem:[#allocation2 + $0x54] sm:$0x1] %v484_v56  ;;  %v494_v60 = vsel %vm4390_vm8, 0, %v493_v27  ;;  %v497_v61 = vsel %vm4390_vm8, 0, %v496_v28  ;;  %v500_v63 = vsel %vm4390_vm8, 0, %v499_v21  ;;  %v487_v1 = vsel %vm4206_vm2, 0, %v486_v59 }
  0x3e   : > { %458 = vst.msk [vmem:[#allocation2 + $0x64] sm:$0xf] %vm400_vm3, %v373_v58  ;;  %495 = vst [vmem:[#allocation2 + $0x8] sm:$0x1] %v494_v60  ;;  %v503_v2 = vsel %vm4390_vm8, 0, %v502_v13  ;;  %v506_v4 = vsel %vm4390_vm8, 0, %v505_v41 }
  0x3f   : > { %498 = vst [vmem:[#allocation2 + $0x14] sm:$0x1] %v497_v61  ;;  %501 = vst [vmem:[#allocation2 + $0x20] sm:$0x1] %v500_v63  ;;  %v509_v6 = vsel %vm4390_vm8, 0, %v508_v48  ;;  %v512_v18 = vsel %vm4390_vm8, 0, %v511_v49 }
  0x40   : > { %488 = vst [vmem:[#allocation2 + $0x60] sm:$0x1] %v487_v1  ;;  %504 = vst [vmem:[#allocation2 + $0x2c] sm:$0x1] %v503_v2  ;;  %v515_v5 = vsel %vm4390_vm8, 0, %v514_v57  ;;  %v521_v19 = vsel %vm4390_vm8, 0, %v520_v42 }
  0x41   : > { %507 = vst [vmem:[#allocation2 + $0x38] sm:$0x1] %v506_v4  ;;  %510 = vst [vmem:[#allocation2 + $0x44] sm:$0x1] %v509_v6  ;;  %v517_v11 = vld [vmem:[#allocation2 + $0x68] sm:$0x1] }
  0x42   : > { %513 = vst [vmem:[#allocation2 + $0x50] sm:$0x1] %v512_v18  ;;  %516 = vst [vmem:[#allocation2 + $0x5c] sm:$0x1] %v515_v5  ;;  %v518_v25 = vsel %vm4390_vm8, 0, %v517_v11  ;;  %526 = sbr.rel (%p3370_p8) target bundleno = 73 (0x49), region = 32 }
  0x43   : > { %522 = vst [vmem:[#allocation2 + $0x74] sm:$0x1] %v521_v19  ;;  %519 = vst [vmem:[#allocation2 + $0x68] sm:$0x1] %v518_v25  ;;  %v527_v16 = vld [vmem:[#allocation2] sm:$0xf] (!%p3370_p8) }
  0x44   : > { %v528_v34 = vsel (!%p3370_p8), %vm4243_vm5, 0, %v527_v16  ;;  %v4134_v35 = vmov (!%p3370_p8), 0  }
  0x45   : > { %v531_v31 = vld [vmem:[#allocation2 + $0x8] sm:$0x1] (!%p3370_p8)  ;;  %530 = vst.msk [vmem:[#allocation2 + $0x4] sm:$0xf] (!%p3370_p8), %vm400_vm3, %v4134_v35  ;;  %529 = vst [vmem:[#allocation2] sm:$0xf] (!%p3370_p8), %v528_v34 }
  0x46   : > { %v532_v23 = vsel (!%p3370_p8), %vm4206_vm2, 0, %v531_v31 }
  0x47   : > { %533 = vst [vmem:[#allocation2 + $0x8] sm:$0x1] (!%p3370_p8), %v532_v23 }
  0x49 PF: > { %p3371_p9 = scmp.le.s32.totalorder %s4116_s12, 0 }
  0x4a   : > { %s3372_s19 = sadd.s32 (!%p3371_p9), 4294967295, %s3367_s4 }
  0x4b   : > { %537 = sbr.rel (%p3371_p9) target bundleno = 87 (0x57), region = 36  ;;  %s3578_s20 = sshll.u32 (!%p3371_p9), %s3372_s19, 3 }
  0x4c   : > { %s541_s21 = scalar_lea.vmem (!%p3371_p9), %s4194_s24, %s3578_s20  ;;  %v564_v39 = vld [vmem:[#allocation2] sm:$0xf] (!%p3371_p9) }
  0x4d   : > { %v542_v7 = vld [vmem:[%s541_s21] sm:$0xf] (!%p3371_p9)  ;;  %v543_v8 = vld [vmem:[%s541_s21 + $0x4] sm:$0xf] (!%p3371_p9) }
  0x4e   : > { %v545_v10 = vshrl.u32 (!%p3371_p9), %v542_v7, 16  ;;  %v548_v12 = vshll.u32 (!%p3371_p9), %v542_v7, 16  ;;  %v553_v14 = vshrl.u32 (!%p3371_p9), %v543_v8, 16  ;;  %v556_v51 = vshll.u32 (!%p3371_p9), %v543_v8, 16  ;;  %v568_v37 = vld [vmem:[#allocation2 + $0x8] sm:$0x1] (!%p3371_p9) }
  0x50   : > { %v547_v15 = vrot.slane (!%p3371_p9), %v545_v10, 7  ;;  %v555_v17 = vrot.slane (!%p3371_p9), %v553_v14, 7 }
  0x52   : > { %v550_v3 = vor.u32 %v548_v12, %v547_v15  ;;  %v551_v47 = vrot.slane %v547_v15, 4  ;;  %v558_v20 = vor.u32 %v556_v51, %v555_v17  ;;  %v560_v26 = vrot.slane %v555_v17, 4 }
  0x54   : > { %v565_v27 = vsel %vm4243_vm5, %v550_v3, %v564_v39  ;;  %v559_v28 = vsel %vm4339_vm7, %v551_v47, %v558_v20  ;;  %v569_v21 = vsel %vm4206_vm2, %v560_v26, %v568_v37 }
  0x55   : > { %566 = vst [vmem:[#allocation2] sm:$0xf] %v565_v27  ;;  %567 = vst.msk [vmem:[#allocation2 + $0x4] sm:$0xf] %vm400_vm3, %v559_v28 }
  0x56   : > { %570 = vst [vmem:[#allocation2 + $0x8] sm:$0x1] %v569_v21 }
  0x57 PF: > { %p3375_p10 = scmp.ne.s32.totalorder %s4116_s12, 1 }
  0x58   : > { %v576_v53 = vld [vmem:[#allocation2 + $0x6c] sm:$0xf] (!%p3375_p10)  ;;  %v580_v29 = vld [vmem:[#allocation2 + $0x74] sm:$0x1] (!%p3375_p10)  ;;  %v4135_v62 = vmov (!%p3375_p10), 0  }
  0x59   : > { %574 = sbr.rel (%p3375_p10) target bundleno = 96 (0x60), region = 40  ;;  %v577_v30 = vsel (!%p3375_p10), %vm4243_vm5, 0, %v576_v53  ;;  %579 = vst.msk [vmem:[#allocation2 + $0x70] sm:$0xf] (!%p3375_p10), %vm400_vm3, %v4135_v62  ;;  %v581_v32 = vsel (!%p3375_p10), %vm4206_vm2, 0, %v580_v29 }
  0x5a   : > { %578 = vst [vmem:[#allocation2 + $0x6c] sm:$0xf] (!%p3375_p10), %v577_v30  ;;  %582 = vst [vmem:[#allocation2 + $0x74] sm:$0x1] (!%p3375_p10), %v581_v32 }
  0x60 PF: > { %p3376_p11 = scmp.ge.s32.totalorder %s4116_s12, 1 }
  0x61   : > { %v3379_v13 = vld [vmem:[%s4211_s8 + $0x40] sm:$0xf] (!%p3376_p11)  ;;  %v3380_v9 = vld [vmem:[%s4211_s8 + $0x44] sm:$0xf] (!%p3376_p11)  ;;  %v614_v42 = vld [vmem:[#allocation2 + $0x6c] sm:$0xf] (!%p3376_p11) }
  0x62   : > { %586 = sbr.rel (%p3376_p11) target bundleno = 107 (0x6b), region = 44  ;;  %v594_v36 = vshrl.u32 (!%p3376_p11), %v3379_v13, 16  ;;  %v597_v22 = vshll.u32 (!%p3376_p11), %v3379_v13, 16  ;;  %v602_v38 = vshrl.u32 (!%p3376_p11), %v3380_v9, 16  ;;  %v605_v33 = vshll.u32 (!%p3376_p11), %v3380_v9, 16 }
  0x63   : > { %v618_v43 = vld [vmem:[#allocation2 + $0x74] sm:$0x1] (!%p3376_p11) }
  0x64   : > { %v596_v40 = vrot.slane (!%p3376_p11), %v594_v36, 7  ;;  %v604_v41 = vrot.slane (!%p3376_p11), %v602_v38, 7 }
  0x66   : > { %v599_v44 = vor.u32 (!%p3376_p11), %v597_v22, %v596_v40  ;;  %v600_v46 = vrot.slane (!%p3376_p11), %v596_v40, 4  ;;  %v607_v45 = vor.u32 (!%p3376_p11), %v605_v33, %v604_v41  ;;  %v609_v48 = vrot.slane (!%p3376_p11), %v604_v41, 4 }
  0x68   : > { %v615_v49 = vsel (!%p3376_p11), %vm4243_vm5, %v599_v44, %v614_v42  ;;  %v608_v50 = vsel (!%p3376_p11), %vm4339_vm7, %v600_v46, %v607_v45  ;;  %v619_v52 = vsel (!%p3376_p11), %vm4206_vm2, %v609_v48, %v618_v43 }
  0x69   : > { %616 = vst [vmem:[#allocation2 + $0x6c] sm:$0xf] %v615_v49  ;;  %617 = vst.msk [vmem:[#allocation2 + $0x70] sm:$0xf] %vm400_vm3, %v608_v50 }
  0x6a   : > { %620 = vst [vmem:[#allocation2 + $0x74] sm:$0x1] %v619_v52 }
  0x6b PF: > { %v3381_v54 = vld [vmem:[%s5243_s1 + $0x4] sm:$0xf]  ;;  %vm892_vm9 = vcmask 1043456   ;;  %v3456_v24 = vld [vmem:[%s5243_s1 + $0x10] sm:$0xf]  ;;  %vm867_vm13 = vcmask 64512  }
  0x6c   : > { %4016 = vmatprep.subr.msk.bf16.mxu1 %vm892_vm9, %v3381_v54  ;;  %4020 = vmatprep.subr.msk.bf16.mxu0 %vm892_vm9, %v3456_v24  ;;  %v894_v0 = vsel %vm892_vm9, %v3381_v54, 0  ;;  %v4487_v55 = vsel %vm892_vm9, %v3456_v24, 0  ;;  %v4489_v56 = vld [vmem:[#allocation2] sm:$0xf]  ;;  %v4491_v57 = vld [vmem:[#allocation2 + $0x4] sm:$0xf] }
  0x6d   : > { %3725 = vmatpush3.bf16.msra.mxu1 %v894_v0  ;;  %3797 = vmatpush3.bf16.msra.mxu0 %v4487_v55  ;;  %v4494_v58 = vld [vmem:[#allocation2 + $0x8] sm:$0x1]  ;;  %vm646_vm10 = vsmask.f32 3328  ;;  %vm647_vm11 = vsmask.f32 7440 }
  0x6e   : > { %v650_v59 = vshrl.u32 %v4489_v56, 16  ;;  %v653_v60 = vshll.u32 %v4489_v56, 16  ;;  %v659_v61 = vshll.u32 %v4491_v57, 16  ;;  %v663_v63 = vshrl.u32 %v4491_v57, 16  ;;  %v637_v1 = vld [vmem:[%s5243_s1] sm:$0xf]  ;;  %vm4523_vm12 = vmor %vm646_vm10, %vm647_vm11 }
  0x6f   : > { %v669_v2 = vshll.u32 %v4494_v58, 16  ;;  %4017 = vmatprep.subr.msk.bf16.mxu1 %vm892_vm9, %v637_v1  ;;  %v1604_v4 = vld [vmem:[#allocation2 + $0xc] sm:$0xf]  ;;  %v4505_v6 = vld [vmem:[#allocation2 + $0x10] sm:$0xf]  ;;  %v1058_v24 = vsel %vm892_vm9, %v637_v1, 0 }
  0x70   : > { %v652_v18 = vrot.slane %v650_v59, 4  ;;  %v655_v5 = vrot.slane %v653_v60, 5  ;;  %v661_v11 = vrot.slane %v659_v61, 5  ;;  %v665_v19 = vrot.slane %v663_v63, 4  ;;  %v4507_v25 = vld [vmem:[#allocation2 + $0x14] sm:$0x1] }
  0x71   : > { %v671_v16 = vrot.slane %v669_v2, 5  ;;  %v1629_v31 = vshrl.u32 %v1604_v4, 16  ;;  %v1632_v34 = vshll.u32 %v1604_v4, 16  ;;  %v1638_v35 = vshll.u32 %v4505_v6, 16  ;;  %v4513_v23 = vld [vmem:[%s5243_s1 + $0x14] sm:$0xf] }
  0x72   : > { %v656_v7 = vor.u32 %v655_v5, %v652_v18  ;;  %v666_v8 = vor.u32 %v665_v19, %v661_v11  ;;  %v1642_v10 = vshrl.u32 %v4505_v6, 16  ;;  %v1648_v12 = vshll.u32 %v4507_v25, 16  ;;  %4022 = vmatprep.subr.msk.bf16.mxu0 %vm892_vm9, %v4513_v23  ;;  %v4519_v14 = vld [vmem:[#allocation2 + $0xc] sm:$0xf]  ;;  %v4527_v37 = vld [vmem:[#allocation2 + $0x10] sm:$0xf] }
  0x73   : > { %v1631_v15 = vrot.slane %v1629_v31, 4  ;;  %v1634_v17 = vrot.slane %v1632_v34, 5  ;;  %v1640_v39 = vrot.slane %v1638_v35, 5  ;;  %v4529_v28 = vld [vmem:[#allocation2 + $0x14] sm:$0x1]  ;;  %v674_v21 = vshrl.u32 %v4519_v14, 16 }
  0x74   : > { %v657_v3 = vrot.slane %v656_v7, 4  ;;  %v667_v47 = vrot.slane %v666_v8, 4  ;;  %v1644_v20 = vrot.slane %v1642_v10, 4  ;;  %v1650_v27 = vrot.slane %v1648_v12, 5  ;;  %v1607_v42 = vld [vmem:[#allocation2 + $0x18] sm:$0xf] }
  0x75   : > { %v1635_v26 = vor.u32 %v1634_v17, %v1631_v15  ;;  %v677_v53 = vshll.u32 %v4519_v14, 16  ;;  %v683_v32 = vshll.u32 %v4527_v37, 16  ;;  %v676_v36 = vrot.slane %v674_v21, 4  ;;  %v4545_v48 = vld [vmem:[#allocation2 + $0x1c] sm:$0xf] }
  0x76   : > { %v662_v29 = vsel %vm4523_vm12, %v657_v3, %v661_v11  ;;  %v672_v30 = vsel %vm4523_vm12, %v667_v47, %v671_v16  ;;  %v1645_v62 = vor.u32 %v1644_v20, %v1640_v39  ;;  %v687_v40 = vshrl.u32 %v4527_v37, 16  ;;  %v4547_v49 = vld [vmem:[#allocation2 + $0x20] sm:$0x1]  ;;  %v4559_v16 = vld [vmem:[#allocation2 + $0x18] sm:$0xf] }
  0x77   : > { %v3382_v13 = vcombine.low %v662_v29, %v672_v30  ;;  %v1636_v9 = vrot.slane %v1635_v26, 4  ;;  %v679_v22 = vrot.slane %v677_v53, 5  ;;  %v685_v33 = vrot.slane %v683_v32, 5  ;;  %v4561_v8 = vld [vmem:[#allocation2 + $0x1c] sm:$0xf] }
  0x78   : > { %v1646_v38 = vrot.slane %v1645_v62, 4  ;;  %v693_v41 = vshll.u32 %v4529_v28, 16  ;;  %v2020_v44 = vrot.slane %v4505_v6, 5  ;;  %v2023_v46 = vrot.slane %v4507_v25, 5 }
  0x79   : > { %3726 = vmatprep.mubr.msk.bf16.mxu1 %vm867_vm13, %v3382_v13  ;;  %v1641_v43 = vsel %vm4523_vm12, %v1636_v9, %v1640_v39  ;;  %v680_v45 = vor.u32 %v679_v22, %v676_v36  ;;  %v689_v52 = vrot.slane %v687_v40, 4  ;;  %v1653_v60 = vshrl.u32 %v1607_v42, 16  ;;  %v4570_v39 = vld [vmem:[#allocation2 + $0x20] sm:$0x1]  ;;  %v4579_v9 = vld [vmem:[#allocation2 + $0x28] sm:$0xf] }
  0x7a   : > { %v1651_v50 = vsel %vm4523_vm12, %v1646_v38, %v1650_v27  ;;  %v695_v54 = vrot.slane %v693_v41, 5  ;;  %v1656_v61 = vshll.u32 %v1607_v42, 16  ;;  %v1662_v2 = vshll.u32 %v4545_v48, 16  ;;  %v1610_v27 = vld [vmem:[#allocation2 + $0x24] sm:$0xf] }
  0x7b   : > { %v3457_v0 = vcombine.low %v1641_v43, %v1651_v50  ;;  %v681_v59 = vrot.slane %v680_v45, 4  ;;  %v690_v63 = vor.u32 %v689_v52, %v685_v33  ;;  %v1666_v4 = vshrl.u32 %v4545_v48, 16  ;;  %v4588_v50 = vld [vmem:[#allocation2 + $0x24] sm:$0xf] }
  0x7c   : > { %v1672_v18 = vshll.u32 %v4547_v49, 16  ;;  %v1655_v11 = vrot.slane %v1653_v60, 4  ;;  %v1658_v19 = vrot.slane %v1656_v61, 5  ;;  %v2027_v1 = vrot.slane %v4545_v48, 5  ;;  %v4591_v60 = vld [vmem:[#allocation2 + $0x28] sm:$0xf] }
  0x7d   : > { %3798 = vmatprep.mubr.msk.bf16.mxu0 %vm867_vm13, %v3457_v0  ;;  %v686_v5 = vsel %vm4523_vm12, %v681_v59, %v685_v33  ;;  %v691_v31 = vrot.slane %v690_v63, 4  ;;  %v1664_v34 = vrot.slane %v1662_v2, 5  ;;  %v1668_v35 = vrot.slane %v1666_v4, 4  ;;  %v4584_v33 = vld [vmem:[#allocation2 + $0x2c] sm:$0x1] }
  0x7e   : > { %v1674_v7 = vrot.slane %v1672_v18, 5  ;;  %v1659_v10 = vor.u32 %v1658_v19, %v1655_v11  ;;  %v4565_v12 = vrot.slane %v2027_v1, 4  ;;  %v2030_v15 = vrot.slane %v4547_v49, 5  ;;  %v4598_v4 = vld [vmem:[%s5243_s1 + $0x18] sm:$0xf] }
  0x7f   : > { %v2125_v17 = vsel %vm892_vm9, %v4513_v23, 0  ;;  %v696_v3 = vsel %vm4523_vm12, %v691_v31, %v695_v54  ;;  %v1669_v47 = vor.u32 %v1668_v35, %v1664_v34  ;;  %v698_v20 = vshrl.u32 %v4559_v16, 16 }
  0x80   : > { %v701_v26 = vshll.u32 %v4559_v16, 16  ;;  %v3383_v21 = vcombine.low %v686_v5, %v696_v3  ;;  %v1660_v53 = vrot.slane %v1659_v10, 4  ;;  %v707_v29 = vshll.u32 %v4561_v8, 16  ;;  %v4605_v10 = vld [vmem:[#allocation2 + $0x2c] sm:$0x1] }
  0x81   : > { %v711_v30 = vshrl.u32 %v4561_v8, 16  ;;  %v1670_v62 = vrot.slane %v1669_v47, 4  ;;  %v700_v32 = vrot.slane %v698_v20, 4  ;;  %v717_v13 = vshll.u32 %v4570_v39, 16  ;;  %v1613_v3 = vld [vmem:[#allocation2 + $0x30] sm:$0xf] }
  0x82   : > { %v703_v23 = vrot.slane %v701_v26, 5  ;;  %3727 = vmatmul.mubr.msk.bf16.vlgmr.msra.gmra.mrb[0].mxu1 %vm867_vm13, %v3383_v21  ;;  %v1665_v36 = vsel %vm4523_vm12, %v1660_v53, %v1664_v34  ;;  %v709_v22 = vrot.slane %v707_v29, 5  ;;  %v1677_v40 = vshrl.u32 %v1610_v27, 16 }
  0x83   : > { %v713_v38 = vrot.slane %v711_v30, 4  ;;  %3743 = vmatpush3.bf16.msra.mxu1 %v1058_v24  ;;  %v1675_v41 = vsel %vm4523_vm12, %v1670_v62, %v1674_v7  ;;  %v719_v43 = vrot.slane %v717_v13, 5  ;;  %v1680_v45 = vshll.u32 %v1610_v27, 16  ;;  %v4613_v30 = vld [vmem:[#allocation2 + $0x34] sm:$0xf] }
  0x84   : > { %v704_v42 = vor.u32 %v703_v23, %v700_v32  ;;  %v3458_v52 = vcombine.low %v1665_v36, %v1675_v41  ;;  %v1679_v0 = vrot.slane %v1677_v40, 4  ;;  %v1686_v59 = vshll.u32 %v4579_v9, 16  ;;  %v4616_v13 = vld [vmem:[#allocation2 + $0x38] sm:$0x1] }
  0x85   : > { %v714_v54 = vor.u32 %v713_v38, %v709_v22  ;;  %v1682_v63 = vrot.slane %v1680_v45, 5  ;;  %v1690_v2 = vshrl.u32 %v4579_v9, 16  ;;  %v1696_v24 = vshll.u32 %v4584_v33, 16 }
  0x86   : > { %v705_v61 = vrot.slane %v704_v42, 4  ;;  %3799 = vmatmul.mubr.msk.bf16.vlgmr.msra.gmra.mrb[0].mxu0 %vm867_vm13, %v3458_v52  ;;  %v1688_v5 = vrot.slane %v1686_v59, 5  ;;  %v722_v11 = vshrl.u32 %v4588_v50, 16  ;;  %v725_v19 = vshll.u32 %v4588_v50, 16  ;;  %v4621_v42 = vld [vmem:[#allocation2 + $0x30] sm:$0xf] }
  0x87   : > { %v715_v18 = vrot.slane %v714_v54, 4  ;;  %3815 = vmatpush3.bf16.msra.mxu0 %v2125_v17  ;;  %v1683_v34 = vor.u32 %v1682_v63, %v1679_v0  ;;  %v1692_v35 = vrot.slane %v1690_v2, 4  ;;  %v1698_v7 = vrot.slane %v1696_v24, 5  ;;  %v4627_v0 = vld [vmem:[%s5243_s1 + $0x8] sm:$0xf] }
  0x88   : > { %v710_v31 = vsel %vm4523_vm12, %v705_v61, %v709_v22  ;;  %v724_v20 = vrot.slane %v722_v11, 4  ;;  %v727_v26 = vrot.slane %v725_v19, 5  ;;  %v731_v27 = vshll.u32 %v4591_v60, 16  ;;  %4023 = vmatprep.subr.msk.bf16.mxu0 %vm892_vm9, %v4598_v4  ;;  %v4632_v24 = vld [vmem:[#allocation2 + $0x34] sm:$0xf]  ;;  %4018 = vmatprep.subr.msk.bf16.mxu1 %vm892_vm9, %v4627_v0 }
  0x89   : > { %v720_v47 = vsel %vm4523_vm12, %v715_v18, %v719_v43  ;;  %v1684_v21 = vrot.slane %v1683_v34, 4  ;;  %v1693_v53 = vor.u32 %v1692_v35, %v1688_v5  ;;  %v735_v29 = vshrl.u32 %v4591_v60, 16 }
  0x8a   : > { %v3384_v17 = vcombine.low %v710_v31, %v720_v47  ;;  %v728_v62 = vor.u32 %v727_v26, %v724_v20  ;;  %v733_v32 = vrot.slane %v731_v27, 5  ;;  %v741_v23 = vshll.u32 %v4605_v10, 16  ;;  %v4641_v47 = vld [vmem:[#allocation2 + $0x38] sm:$0x1] }
  0x8b   : > { %v1701_v36 = vshrl.u32 %v1613_v3, 16  ;;  %v1689_v22 = vsel %vm4523_vm12, %v1684_v21, %v1688_v5  ;;  %v1694_v38 = vrot.slane %v1693_v53, 4  ;;  %v737_v40 = vrot.slane %v735_v29, 4 }
  0x8c   : > { %3730 = vmatprep.mubr.msk.bf16.mxu1 %vm867_vm13, %v3384_v17  ;;  %v1704_v41 = vshll.u32 %v1613_v3, 16  ;;  %v729_v43 = vrot.slane %v728_v62, 4  ;;  %v743_v45 = vrot.slane %v741_v23, 5  ;;  %v1710_v54 = vshll.u32 %v4613_v30, 16  ;;  %v1986_v62 = vld [vmem:[#allocation2 + $0xc] sm:$0xe] }
  0x8d   : > { %v1703_v52 = vrot.slane %v1701_v36, 4  ;;  %v1699_v59 = vsel %vm4523_vm12, %v1694_v38, %v1698_v7  ;;  %v738_v61 = vor.u32 %v737_v40, %v733_v32  ;;  %v1714_v2 = vshrl.u32 %v4613_v30, 16  ;;  %v4648_v38 = vld [vmem:[#allocation2 + $0x3c] sm:$0xf] }
  0x8e   : > { %v1706_v63 = vrot.slane %v1704_v41, 5  ;;  %v3459_v18 = vcombine.low %v1689_v22, %v1699_v59  ;;  %v734_v5 = vsel %vm4523_vm12, %v729_v43, %v733_v32  ;;  %v1712_v11 = vrot.slane %v1710_v54, 5  ;;  %v4654_v59 = vld [vmem:[#allocation2 + $0x40] sm:$0xf] }
  0x8f   : > { %v1720_v19 = vshll.u32 %v4616_v13, 16  ;;  %v739_v31 = vrot.slane %v738_v61, 4  ;;  %v1716_v35 = vrot.slane %v1714_v2, 4  ;;  %v746_v7 = vshrl.u32 %v4621_v42, 16  ;;  %v4656_v61 = vld [vmem:[#allocation2 + $0x44] sm:$0x1] }
  0x90   : > { %v1707_v34 = vor.u32 %v1706_v63, %v1703_v52  ;;  %3802 = vmatprep.mubr.msk.bf16.mxu0 %vm867_vm13, %v3459_v18  ;;  %v749_v20 = vshll.u32 %v4621_v42, 16  ;;  %v755_v26 = vshll.u32 %v4632_v24, 16  ;;  %v759_v27 = vshrl.u32 %v4632_v24, 16 }
  0x91   : > { %v1722_v3 = vrot.slane %v1720_v19, 5  ;;  %v744_v17 = vsel %vm4523_vm12, %v739_v31, %v743_v45  ;;  %v1717_v53 = vor.u32 %v1716_v35, %v1712_v11  ;;  %v748_v29 = vrot.slane %v746_v7, 4  ;;  %v1987_v19 = vld [vmem:[#allocation2 + $0x18] sm:$0xe] }
  0x92   : > { %v1708_v21 = vrot.slane %v1707_v34, 4  ;;  %v3385_v32 = vcombine.low %v734_v5, %v744_v17  ;;  %v751_v23 = vrot.slane %v749_v20, 5  ;;  %v757_v36 = vrot.slane %v755_v26, 5 }
  0x93   : > { %v761_v22 = vrot.slane %v759_v27, 4  ;;  %v1718_v41 = vrot.slane %v1717_v53, 4  ;;  %v765_v43 = vshll.u32 %v4641_v47, 16  ;;  %vm1181_vm14 = vcmask 1042432  }
  0x94   : > { %v1713_v40 = vsel %vm4523_vm12, %v1708_v21, %v1712_v11  ;;  %3731 = vmatmul.mubr.msk.bf16.gmra.mrb[4].mxu1 %vm867_vm13, %v3385_v32  ;;  %v752_v45 = vor.u32 %v751_v23, %v748_v29  ;;  %vm1182_vm15 = vcmask 1046532   ;;  %v3473_v54 = vrot.slane %v1986_v62, 9  ;;  %v4679_v21 = vld [vmem:[#allocation2 + $0x4c] sm:$0xf]  ;;  %v4688_v23 = vld [vmem:[#allocation2 + $0x50] sm:$0x1] }
  0x95   : > { %v762_v52 = vor.u32 %v761_v22, %v757_v36  ;;  %v1723_v63 = vsel %vm4523_vm12, %v1718_v41, %v1722_v3  ;;  %v767_v2 = vrot.slane %v765_v43, 5  ;;  %vm4660_vm0 = vmor %vm1181_vm14, %vm1182_vm15  ;;  %v2022_v5 = vrot.slane %v2020_v44, 4  ;;  %v4671_v3 = vld [vmem:[#allocation2 + $0x48] sm:$0xf] }
  0x96   : > { %v770_v11 = vshrl.u32 %v4648_v38, 16  ;;  %v3460_v31 = vcombine.low %v1713_v40, %v1723_v63  ;;  %v753_v34 = vrot.slane %v752_v45, 4  ;;  %v2021_v7 = vsel %vm4660_vm0, %v3473_v54, %v2020_v44 }
  0x97   : > { %v763_v35 = vrot.slane %v762_v52, 4  ;;  %v2024_v20 = vsel %vm4660_vm0, %v2022_v5, %v2023_v46  ;;  %v773_v27 = vshll.u32 %v4648_v38, 16  ;;  %v779_v17 = vshll.u32 %v4654_v59, 16 }
  0x98   : > { %v772_v26 = vrot.slane %v770_v11, 4  ;;  %3803 = vmatmul.mubr.msk.bf16.gmra.mrb[4].mxu0 %vm867_vm13, %v3460_v31  ;;  %v758_v6 = vsel %vm4523_vm12, %v753_v34, %v757_v36  ;;  %v3482_v53 = vcombine.low %v2021_v7, %v2024_v20  ;;  %v783_v25 = vshrl.u32 %v4654_v59, 16  ;;  %v4707_v31 = vld [vmem:[#allocation2 + $0x54] sm:$0xf]  ;;  %v4709_v34 = vld [vmem:[#allocation2 + $0x58] sm:$0xf] }
  0x99   : > { %v768_v44 = vsel %vm4523_vm12, %v763_v35, %v767_v2  ;;  %v775_v46 = vrot.slane %v773_v27, 5  ;;  %v781_v62 = vrot.slane %v779_v17, 5  ;;  %v789_v32 = vshll.u32 %v4656_v61, 16 }
  0x9a   : > { %v3386_v29 = vcombine.low %v758_v6, %v768_v44  ;;  %3816 = vmatprep.mubr.msk.bf16.mxu0 %vm867_vm13, %v3482_v53  ;;  %v785_v22 = vrot.slane %v783_v25, 4  ;;  %v3474_v40 = vrot.slane %v1987_v19, 9  ;;  %v2031_v36 = vsel %vm4660_vm0, %v4565_v12, %v2030_v15  ;;  %v1988_v15 = vld [vmem:[#allocation2 + $0x24] sm:$0xe]  ;;  %v4718_v6 = vld [vmem:[%s5243_s1 + $0x1c] sm:$0xf] }
  0x9b   : > { %v2324_v41 = vsel %vm892_vm9, %v4598_v4, 0  ;;  %v776_v43 = vor.u32 %v775_v46, %v772_v26  ;;  %v791_v45 = vrot.slane %v789_v32, 5  ;;  %v794_v52 = vshrl.u32 %v4671_v3, 16  ;;  %v4724_v46 = vld [vmem:[#allocation2 + $0x5c] sm:$0x1] }
  0x9c   : > { %3734 = vmatprep.mubr.msk.bf16.mxu1 %vm867_vm13, %v3386_v29  ;;  %v797_v54 = vshll.u32 %v4671_v3, 16  ;;  %v786_v63 = vor.u32 %v785_v22, %v781_v62  ;;  %v2028_v49 = vsel %vm4660_vm0, %v3474_v40, %v2027_v1  ;;  %v803_v2 = vshll.u32 %v4679_v21, 16  ;;  %v1989_v40 = vld [vmem:[#allocation2 + $0x30] sm:$0xe] }
  0x9d   : > { %v807_v12 = vshrl.u32 %v4679_v21, 16  ;;  %v777_v4 = vrot.slane %v776_v43, 4  ;;  %v3483_v5 = vcombine.low %v2028_v49, %v2031_v36  ;;  %v796_v11 = vrot.slane %v794_v52, 4 }
  0x9e   : > { %v799_v19 = vrot.slane %v797_v54, 5  ;;  %v787_v35 = vrot.slane %v786_v63, 4  ;;  %v805_v7 = vrot.slane %v803_v2, 5  ;;  %v813_v48 = vshll.u32 %v4688_v23, 16  ;;  %v4731_v54 = vld [vmem:[#allocation2 + $0x40] sm:$0xf] }
  0x9f   : > { %v809_v20 = vrot.slane %v807_v12, 4  ;;  %v782_v1 = vsel %vm4523_vm12, %v777_v4, %v781_v62  ;;  %v3475_v27 = vrot.slane %v1988_v15, 9  ;;  %v2034_v17 = vrot.slane %v4579_v9, 5 }
  0xa0   : > { %v800_v26 = vor.u32 %v799_v19, %v796_v11  ;;  %v792_v44 = vsel %vm4523_vm12, %v787_v35, %v791_v45  ;;  %3817 = vmatmul.mubr.msk.bf16.vlgmr.msra.gmra.mrb[0].mxu0 %vm867_vm13, %v3483_v5  ;;  %v815_v25 = vrot.slane %v813_v48, 5  ;;  %v2037_v29 = vrot.slane %v4584_v33, 5  ;;  %v4744_v5 = vld [vmem:[#allocation2 + $0x44] sm:$0x1]  ;;  %v1990_v11 = vld [vmem:[#allocation2 + $0x3c] sm:$0xe] }
  0xa1   : > { %v810_v53 = vor.u32 %v809_v20, %v805_v7  ;;  %v3387_v62 = vcombine.low %v782_v1, %v792_v44  ;;  %3833 = vmatpush3.bf16.msra.mxu0 %v2324_v41  ;;  %v2035_v9 = vsel %vm4660_vm0, %v3475_v27, %v2034_v17  ;;  %v2036_v22 = vrot.slane %v2034_v17, 4 }
  0xa2   : > { %v801_v32 = vrot.slane %v800_v26, 4  ;;  %v818_v43 = vshrl.u32 %v4707_v31, 16  ;;  %v821_v45 = vshll.u32 %v4707_v31, 16  ;;  %v827_v52 = vshll.u32 %v4709_v34, 16  ;;  %4024 = vmatprep.subr.msk.bf16.mxu0 %vm892_vm9, %v4718_v6 }
  0xa3   : > { %v811_v36 = vrot.slane %v810_v53, 4  ;;  %3735 = vmatmul.mubr.msk.bf16.gmra.mrb[8].mxu1 %vm867_vm13, %v3387_v62  ;;  %v2038_v41 = vsel %vm4660_vm0, %v2036_v22, %v2037_v29  ;;  %v831_v63 = vshrl.u32 %v4709_v34, 16  ;;  %v837_v49 = vshll.u32 %v4724_v46, 16 }
  0xa4   : > { %v806_v33 = vsel %vm4523_vm12, %v801_v32, %v805_v7  ;;  %v3484_v12 = vcombine.low %v2035_v9, %v2038_v41  ;;  %v820_v15 = vrot.slane %v818_v43, 4  ;;  %v823_v4 = vrot.slane %v821_v45, 5  ;;  %v4762_v43 = vld [vmem:[#allocation2 + $0x50] sm:$0x1]  ;;  %v1991_v45 = vld [vmem:[#allocation2 + $0x48] sm:$0xe] }
  0xa5   : > { %v816_v2 = vsel %vm4523_vm12, %v811_v36, %v815_v25  ;;  %v829_v35 = vrot.slane %v827_v52, 5  ;;  %v833_v20 = vrot.slane %v831_v63, 4  ;;  %v839_v7 = vrot.slane %v837_v49, 5  ;;  %v4760_v36 = vld [vmem:[#allocation2 + $0x4c] sm:$0xf] }
  0xa6   : > { %v3388_v19 = vcombine.low %v806_v33, %v816_v2  ;;  %3820 = vmatprep.mubr.msk.bf16.mxu0 %vm867_vm13, %v3484_v12  ;;  %v824_v48 = vor.u32 %v823_v4, %v820_v15  ;;  %v3476_v1 = vrot.slane %v1989_v40, 9  ;;  %v2041_v26 = vrot.slane %v4613_v30, 5  ;;  %v4770_v49 = vld [vmem:[#allocation2 + $0x58] sm:$0xf]  ;;  %v1992_v2 = vld [vmem:[#allocation2 + $0x54] sm:$0xe] }
  0xa7   : > { %v2044_v27 = vrot.slane %v4616_v13, 5  ;;  %v834_v17 = vor.u32 %v833_v20, %v829_v35  ;;  %v3477_v44 = vrot.slane %v1990_v11, 9  ;;  %v2048_v53 = vrot.slane %v4731_v54, 5  ;;  %v4772_v4 = vld [vmem:[#allocation2 + $0x5c] sm:$0x1] }
  0xa8   : > { %3738 = vmatprep.mubr.msk.bf16.mxu1 %vm867_vm13, %v3388_v19  ;;  %v2051_v25 = vrot.slane %v4744_v5, 5  ;;  %v825_v29 = vrot.slane %v824_v48, 4  ;;  %v2042_v62 = vsel %vm4660_vm0, %v3476_v1, %v2041_v26  ;;  %v2043_v32 = vrot.slane %v2041_v26, 4  ;;  %5262 = vst [vmem:[#allocation3_spill] sm:$0xff] %v4772_v4  ;;  %v4777_v20 = vld [vmem:[#allocation2 + $0x64] sm:$0xf] }
  0xa9   : > { %v835_v9 = vrot.slane %v834_v17, 4  ;;  %v2049_v22 = vsel %vm4660_vm0, %v3477_v44, %v2048_v53  ;;  %v2050_v30 = vrot.slane %v2048_v53, 4  ;;  %v3398_v41 = vcombine.low %v4489_v56, %v4491_v57  ;;  %5263 = vst [vmem:[#allocation4_spill] sm:$0xff] %v4777_v20  ;;  %v4782_v48 = vld [vmem:[#allocation2 + $0x68] sm:$0x1] }
  0xaa   : > { %v830_v13 = vsel %vm4523_vm12, %v825_v29, %v829_v35  ;;  %v2045_v40 = vsel %vm4660_vm0, %v2043_v32, %v2044_v27  ;;  %v3478_v11 = vrot.slane %v1991_v45, 9  ;;  %v2055_v19 = vrot.slane %v4760_v36, 5  ;;  %5264 = vst [vmem:[#allocation5_spill] sm:$0xff] %v4782_v48  ;;  %v1993_v1 = vld [vmem:[#allocation2 + $0x60] sm:$0xe] }
  0xab   : > { %v840_v52 = vsel %vm4523_vm12, %v835_v9, %v839_v7  ;;  %v3485_v33 = vcombine.low %v2042_v62, %v2045_v40  ;;  %v2052_v63 = vsel %vm4660_vm0, %v2050_v30, %v2051_v25  ;;  %v2058_v35 = vrot.slane %v4762_v43, 5  ;;  %v1158_v9 = vld [vmem:[#allocation2 + $0xc] sm:$0xe] }
  0xac   : > { %v3389_v12 = vcombine.low %v830_v13, %v840_v52  ;;  %v3486_v15 = vcombine.low %v2049_v22, %v2052_v63  ;;  %v3479_v56 = vrot.slane %v1992_v2, 9  ;;  %v2062_v7 = vrot.slane %v4770_v49, 5  ;;  %v1159_v22 = vld [vmem:[#allocation2 + $0x18] sm:$0xe]  ;;  %v1160_v2 = vld [vmem:[#allocation2 + $0x24] sm:$0xe] }
  0xad   : > { %3821 = vmatmul.mubr.msk.bf16.gmra.mrb[4].mxu0 %vm867_vm13, %v3485_v33  ;;  %v2056_v26 = vsel %vm4660_vm0, %v3478_v11, %v2055_v19  ;;  %v2057_v27 = vrot.slane %v2055_v19, 4  ;;  %v2065_v17 = vrot.slane %v4772_v4, 5  ;;  %v1193_v25 = vrot.slane %v4527_v37, 5  ;;  %v1161_v19 = vld [vmem:[#allocation2 + $0x30] sm:$0xe] }
  0xae   : > { %3739 = vmatmul.mubr.msk.bf16.gmra.mrb[12].mxu1 %vm867_vm13, %v3389_v12  ;;  %3824 = vmatprep.mubr.msk.bf16.mxu0 %vm867_vm13, %v3486_v15  ;;  %v2063_v44 = vsel %vm4660_vm0, %v3479_v56, %v2062_v7  ;;  %v2064_v53 = vrot.slane %v2062_v7, 4  ;;  %v3399_v29 = vcombine.low %v4519_v14, %v4527_v37  ;;  %v2069_v32 = vrot.slane %v4777_v20, 5  ;;  %v4808_v12 = vld [vmem:[%s5243_s1 + $0xc] sm:$0xf]  ;;  %v5050_v4 = vld [vmem:[#allocation2 + $0x70] sm:$0xf] }
  0xaf   : > { %3744 = vmatprep.mubr.msk.bf16.mxu1 %vm867_vm13, %v3398_v41  ;;  %v2059_v62 = vsel %vm4660_vm0, %v2057_v27, %v2058_v35  ;;  %v3480_v40 = vrot.slane %v1993_v1, 9  ;;  %v2072_v45 = vrot.slane %v4782_v48, 5  ;;  %v1196_v52 = vrot.slane %v4529_v28, 5 }
  0xb0   : > { %v3487_v30 = vcombine.low %v2056_v26, %v2059_v62  ;;  %v2066_v13 = vsel %vm4660_vm0, %v2064_v53, %v2065_v17  ;;  %v3400_v33 = vcombine.low %v4559_v16, %v4561_v8  ;;  %v2071_v37 = vrot.slane %v2069_v32, 4 }
  0xb1   : > { %v3488_v14 = vcombine.low %v2063_v44, %v2066_v13  ;;  %v1291_v41 = vsel %vm892_vm9, %v4627_v0, 0  ;;  %v3415_v63 = vrot.slane %v1158_v9, 9  ;;  %v1195_v15 = vrot.slane %v1193_v25, 4  ;;  %v1162_v13 = vld [vmem:[#allocation2 + $0x3c] sm:$0xe] }
  0xb2   : > { %v3416_v11 = vrot.slane %v1159_v22, 9  ;;  %v2070_v28 = vsel %vm4660_vm0, %v3480_v40, %v2069_v32  ;;  %v2073_v16 = vsel %vm4660_vm0, %v2071_v37, %v2072_v45  ;;  %v1200_v56 = vrot.slane %v4561_v8, 5 }
  0xb3   : > { %v4818_v0 = vsel %vm4660_vm0, %v3415_v63, %v1193_v25  ;;  %v4823_v35 = vsel %vm4660_vm0, %v1195_v15, %v1196_v52  ;;  %v1203_v7 = vrot.slane %v4570_v39, 5  ;;  %v3417_v1 = vrot.slane %v1160_v2, 9  ;;  %v4076_v15 = vld [vmem:[#allocation2 + $0x24] sm:$0xff]  }
  0xb4   : > { %v3401_v26 = vcombine.low %v4588_v50, %v4591_v60  ;;  %v1207_v17 = vrot.slane %v4591_v60, 5  ;;  %v1210_v44 = vrot.slane %v4605_v10, 5  ;;  %v3489_v53 = vcombine.low %v2070_v28, %v2073_v16  ;;  %v1157_v10 = vld [vmem:[#allocation2] sm:$0xe] }
  0xb5   : > { %3825 = vmatmul.mubr.msk.bf16.gmra.mrb[8].mxu0 %vm867_vm13, %v3487_v30  ;;  %v4837_v8 = vsel %vm4660_vm0, %v3416_v11, %v1200_v56  ;;  %v1202_v39 = vrot.slane %v1200_v56, 4  ;;  %v3418_v25 = vrot.slane %v1161_v19, 9  ;;  %v1214_v32 = vrot.slane %v4632_v24, 5  ;;  %v2439_v11 = vld [vmem:[#allocation2 + $0x18] sm:$0xf] }
  0xb6   : > { %3745 = vmatmul.mubr.msk.bf16.vlgmr.msra.gmra.mrb[0].mxu1 %vm867_vm13, %v3399_v29  ;;  %3828 = vmatprep.mubr.msk.bf16.mxu0 %vm867_vm13, %v3488_v14  ;;  %v4074_v29 = vld [vmem:[#allocation2 + $0x18] sm:$0xff]   ;;  %v4841_v50 = vsel %vm4660_vm0, %v3417_v1, %v1207_v17  ;;  %v1209_v62 = vrot.slane %v1207_v17, 4  ;;  %v1217_v9 = vrot.slane %v4641_v47, 5  ;;  %v3402_v60 = vcombine.low %v4621_v42, %v4632_v24 }
  0xb7   : > { %3761 = vmatpush3.bf16.msra.mxu1 %v1291_v41  ;;  %3748 = vmatprep.mubr.msk.bf16.mxu1 %vm867_vm13, %v3400_v33  ;;  %v1186_v22 = vrot.slane %v4491_v57, 5  ;;  %v4850_v30 = vsel %vm4660_vm0, %v1202_v39, %v1203_v7  ;;  %v4860_v47 = vsel %vm4660_vm0, %v3418_v25, %v1214_v32  ;;  %v1216_v42 = vrot.slane %v1214_v32, 4  ;;  %v4883_v56 = vld [vmem:[#allocation2 + $0x1c] sm:$0xf]  ;;  %v1163_v7 = vld [vmem:[#allocation2 + $0x48] sm:$0xe] }
  0xb8   : > { %4019 = vmatprep.subr.msk.bf16.mxu1 %vm892_vm9, %v4808_v12  ;;  %v4856_v45 = vsel %vm4660_vm0, %v1209_v62, %v1210_v44  ;;  %v3419_v52 = vrot.slane %v1162_v13, 9  ;;  %v3414_v33 = vrot.slane %v1157_v10, 9  ;;  %v1221_v37 = vrot.slane %v4654_v59, 5  ;;  %v4905_v39 = vld [vmem:[%s5243_s1 + $0x20] sm:$0xf] }
  0xb9   : > { %v4869_v24 = vsel %vm4660_vm0, %v1216_v42, %v1217_v9  ;;  %v1224_v41 = vrot.slane %v4656_v61, 5  ;;  %v1189_v63 = vrot.slane %v4494_v58, 5  ;;  %v1188_v2 = vrot.slane %v1186_v22, 4  ;;  %v4078_v61 = vld [vmem:[#allocation2 + $0x30] sm:$0xff]   ;;  %v2442_v32 = vld [vmem:[#allocation2 + $0x24] sm:$0xf] }
  0xba   : > { %v4879_v28 = vsel %vm4660_vm0, %v3419_v52, %v1221_v37  ;;  %v1223_v16 = vrot.slane %v1221_v37, 4  ;;  %v3403_v19 = vcombine.low %v4648_v38, %v4654_v59  ;;  %v2706_v1 = vsel %vm892_vm9, %v4718_v6, 0  ;;  %v4912_v9 = vld [vmem:[#allocation2 + $0x28] sm:$0xf]  ;;  %v1164_v52 = vld [vmem:[#allocation2 + $0x54] sm:$0xe] }
  0xbb   : > { %v3404_v58 = vcombine.low %v4671_v3, %v4679_v21  ;;  %v1190_v38 = vsel %vm4660_vm0, %v1188_v2, %v1189_v63  ;;  %v2464_v59 = vshrl.u32 %v2439_v11, 16  ;;  %v2467_v44 = vshll.u32 %v2439_v11, 16  ;;  %v4081_v11 = vld [vmem:[#allocation2 + $0x48] sm:$0xff]  }
  0xbc   : > { %v4893_v17 = vsel %vm4660_vm0, %v1223_v16, %v1224_v41  ;;  %v2473_v3 = vshll.u32 %v4883_v56, 16  ;;  %v2477_v6 = vshrl.u32 %v4883_v56, 16  ;;  %v3420_v25 = vrot.slane %v1163_v7, 9 }
  0xbd   : > { %3829 = vmatmul.mubr.msk.bf16.gmra.mrb[12].mxu0 %vm867_vm13, %v3489_v53  ;;  %v1231_v62 = vrot.slane %v4688_v23, 5  ;;  %v2466_v42 = vrot.slane %v2464_v59, 4  ;;  %v2445_v23 = vld [vmem:[#allocation2 + $0x30] sm:$0xf]  ;;  %v2469_v37 = vrot.slane %v2467_v44, 5  ;;  %v2488_v16 = vshrl.u32 %v2442_v32, 16 }
  0xbe   : > { %3749 = vmatmul.mubr.msk.bf16.gmra.mrb[4].mxu1 %vm867_vm13, %v3401_v26  ;;  %3834 = vmatprep.mubr.msk.bf16.mxu0 %vm867_vm13, %v4074_v29  ;;  %v1187_v26 = vsel %vm4660_vm0, %v3414_v33, %v1186_v22  ;;  %v1228_v29 = vrot.slane %v4679_v21, 5  ;;  %v1758_v22 = vshll.u32 %v4760_v36, 16  ;;  %v3405_v21 = vcombine.low %v4707_v31, %v4709_v34  ;;  %v4080_v33 = vld [vmem:[#allocation2 + $0x3c] sm:$0xff]   ;;  %v2451_v53 = vld [vmem:[#allocation2 + $0x48] sm:$0xf] }
  0xbf   : > { %3752 = vmatprep.mubr.msk.bf16.mxu1 %vm867_vm13, %v3402_v60  ;;  %v3423_v13 = vcombine.low %v1187_v26, %v1190_v38  ;;  %v4923_v41 = vrot.slane %v2473_v3, 5  ;;  %v2479_v63 = vrot.slane %v2477_v6, 4  ;;  %v4931_v31 = vld [vmem:[#allocation2 + $0x20] sm:$0x1]  ;;  %v2497_v7 = vshll.u32 %v4912_v9, 16 }
  0xc0   : > { %v4916_v60 = vsel %vm4660_vm0, %v3420_v25, %v1228_v29  ;;  %v1230_v10 = vrot.slane %v1228_v29, 4  ;;  %v2515_v26 = vshll.u32 %v2445_v23, 16  ;;  %v3421_v38 = vrot.slane %v1164_v52, 9  ;;  %v4952_v52 = vld [vmem:[#allocation2 + $0x2c] sm:$0x1] }
  0xc1   : > { %v1235_v3 = vrot.slane %v4709_v34, 5  ;;  %v1238_v6 = vrot.slane %v4724_v46, 5  ;;  %v1762_v25 = vshrl.u32 %v4760_v36, 16  ;;  %v2470_v29 = vor.u32 %v2469_v37, %v2466_v42  ;;  %v4082_v36 = vld [vmem:[#allocation2 + $0x54] sm:$0xff]  }
  0xc2   : > { %v4927_v2 = vsel %vm4660_vm0, %v1230_v10, %v1231_v62  ;;  %v2480_v62 = vor.u32 %v2479_v63, %v4923_v41  ;;  %v2490_v10 = vrot.slane %v2488_v16, 4  ;;  %v4954_v42 = vrot.slane %v2497_v7, 5  ;;  %v4958_v16 = vld [vmem:[#allocation2 + $0x38] sm:$0x1] }
  0xc3   : > { %v4949_v34 = vsel %vm4660_vm0, %v3421_v38, %v1235_v3  ;;  %v1237_v46 = vrot.slane %v1235_v3, 4  ;;  %v2517_v63 = vrot.slane %v2515_v26, 5 }
  0xc4   : > { %v2481_v26 = vrot.slane %v2480_v62, 4 }
  0xc5   : > { %3835 = vmatmul.mubr.msk.bf16.vlgmr.msra.gmra.mrb[0].mxu0 %vm867_vm13, %v4076_v15  ;;  %v4929_v15 = vld [vmem:[#allocation2 + $0x34] sm:$0xf]  ;;  %v4964_v3 = vsel %vm4660_vm0, %v1237_v46, %v1238_v6  ;;  %v4977_v46 = vld [vmem:[#allocation2 + $0x4c] sm:$0xf] }
  0xc6   : > { %3753 = vmatmul.mubr.msk.bf16.gmra.mrb[8].mxu1 %vm867_vm13, %v3403_v19  ;;  %3851 = vmatpush3.bf16.msra.mxu0 %v2706_v1  ;;  %v2491_v19 = vshll.u32 %v2442_v32, 16  ;;  %v2521_v59 = vshll.u32 %v4929_v15, 16  ;;  %v2525_v44 = vshrl.u32 %v4929_v15, 16  ;;  %v2483_v32 = vshll.u32 %v4931_v31, 16 }
  0xc7   : > { %3756 = vmatprep.mubr.msk.bf16.mxu1 %vm867_vm13, %v3404_v58  ;;  %3838 = vmatprep.mubr.msk.bf16.mxu0 %vm867_vm13, %v4078_v61  ;;  %v2501_v58 = vshrl.u32 %v4912_v9, 16  ;;  %v2512_v61 = vshrl.u32 %v2445_v23, 16  ;;  %v2471_v1 = vrot.slane %v2470_v29, 4  ;;  %v2531_v29 = vshll.u32 %v4958_v16, 16 }
  0xc8   : > { %4025 = vmatprep.subr.msk.bf16.mxu0 %vm892_vm9, %v4905_v39  ;;  %v2493_v23 = vrot.slane %v2491_v19, 5  ;;  %v4960_v19 = vrot.slane %v2521_v59, 5  ;;  %v2527_v38 = vrot.slane %v2525_v44, 4  ;;  %v2485_v59 = vrot.slane %v2483_v32, 5 }
  0xc9   : > { %v2514_v37 = vrot.slane %v2512_v61, 4  ;;  %v4970_v61 = vld [vmem:[#allocation2 + $0x40] sm:$0xf]  ;;  %v2507_v44 = vshll.u32 %v4952_v52, 16  ;;  %v2560_v32 = vshrl.u32 %v2451_v53, 16 }
  0xca   : > { %v2494_v14 = vor.u32 %v2493_v23, %v2490_v10  ;;  %v2528_v7 = vor.u32 %v2527_v38, %v4960_v19  ;;  %v2545_v27 = vshll.u32 %v4970_v61, 16  ;;  %v2549_v62 = vshrl.u32 %v4970_v61, 16 }
  0xcb   : > { %v2563_v10 = vshll.u32 %v2451_v53, 16  ;;  %v5265_v23 = vcombine.low %v4818_v0, %v4823_v35  ;;  %v5266_v53 = vcombine.low %v4837_v8, %v4850_v30  ;;  %v4084_v0 = vld [vmem:[#allocation2 + $0x6c] sm:$0xff]   ;;  %v5007_v8 = vld [vmem:[#allocation2 + $0x44] sm:$0x1] }
  0xcc   : > { %v2495_v35 = vrot.slane %v2494_v14, 4  ;;  %v2551_v30 = vrot.slane %v2549_v62, 4  ;;  %v2562_v14 = vrot.slane %v2560_v32, 4  ;;  %v2457_v32 = vld [vmem:[#allocation2 + $0x60] sm:$0xf] }
  0xcd   : > { %3839 = vmatmul.mubr.msk.bf16.gmra.mrb[4].mxu0 %vm867_vm13, %v4080_v33  ;;  %v2503_v33 = vrot.slane %v2501_v58, 4  ;;  %v2448_v58 = vld [vmem:[#allocation2 + $0x3c] sm:$0xf] }
  0xce   : > { %3757 = vmatmul.mubr.msk.bf16.gmra.mrb[12].mxu1 %vm867_vm13, %v3405_v21  ;;  %3842 = vmatprep.mubr.msk.bf16.mxu0 %vm867_vm13, %v4081_v11  ;;  %v4956_v21 = vrot.slane %v1758_v22, 5  ;;  %v4083_v11 = vld [vmem:[#allocation2 + $0x60] sm:$0xff]   ;;  %v1489_v22 = vsel %vm892_vm9, %v4808_v12, 0  ;;  %v2536_v57 = vshrl.u32 %v2448_v58, 16  ;;  %v2539_v40 = vshll.u32 %v2448_v58, 16 }
  0xcf   : > { %3762 = vmatprep.mubr.msk.bf16.mxu1 %vm867_vm13, %v3423_v13  ;;  %v4966_v13 = vrot.slane %v1762_v25, 4  ;;  %v2504_v6 = vor.u32 %v2503_v33, %v4954_v42  ;;  %v2518_v25 = vor.u32 %v2517_v63, %v2514_v37  ;;  %v2476_v12 = vsel %vm4523_vm12, %v2471_v1, %v4923_v41  ;;  %v2454_v41 = vld [vmem:[#allocation2 + $0x54] sm:$0xf] }
  0xd0   : > { %v2486_v33 = vsel %vm4523_vm12, %v2481_v26, %v2485_v59  ;;  %v2509_v37 = vrot.slane %v2507_v44, 5  ;;  %v2573_v63 = vshrl.u32 %v4977_v46, 16  ;;  %v2529_v58 = vrot.slane %v2528_v7, 4  ;;  %v4093_v44 = vld [vmem:[%s5243_s1 + $0x10] sm:$0xf] }
  0xd1   : > { %v2505_v1 = vrot.slane %v2504_v6, 4  ;;  %v2519_v38 = vrot.slane %v2518_v25, 4  ;;  %v2541_v26 = vrot.slane %v2539_v40, 5  ;;  %v4999_v59 = vrot.slane %v2545_v27, 5  ;;  %v5009_v7 = vld [vmem:[#allocation2 + $0x50] sm:$0x1] }
  0xd2   : > { %v2565_v6 = vrot.slane %v2563_v10, 5  ;;  %v2584_v25 = vshrl.u32 %v2454_v41, 16  ;;  %v2575_v27 = vrot.slane %v2573_v63, 4  ;;  %v5026_v63 = vld [vmem:[#allocation2 + $0x64] sm:$0xf] }
  0xd5   : > { %3843 = vmatmul.mubr.msk.bf16.gmra.mrb[8].mxu0 %vm867_vm13, %v4082_v36  ;;  %v2569_v36 = vshll.u32 %v4977_v46, 16 }
  0xd6   : > { %3763 = vmatmul.mubr.msk.bf16.vlgmr.msra.gmra.mrb[0].mxu1 %vm867_vm13, %v5265_v23  ;;  %3846 = vmatprep.mubr.msk.bf16.mxu0 %vm867_vm13, %v4083_v11  ;;  %v2533_v11 = vrot.slane %v2531_v29, 5  ;;  %v2538_v23 = vrot.slane %v2536_v57, 4  ;;  %v3516_v29 = vcombine.low %v2476_v12, %v2486_v33  ;;  %v2587_v57 = vshll.u32 %v2454_v41, 16 }
  0xd7   : > { %3779 = vmatpush3.bf16.msra.mxu1 %v1489_v22  ;;  %3766 = vmatprep.mubr.msk.bf16.mxu1 %vm867_vm13, %v5266_v53  ;;  %v5005_v22 = vld [vmem:[#allocation2 + $0x58] sm:$0xf]  ;;  %v5011_v40 = vrot.slane %v2569_v36, 5  ;;  %v2500_v53 = vsel %vm4523_vm12, %v2495_v35, %v4954_v42  ;;  %v2524_v12 = vsel %vm4523_vm12, %v2519_v38, %v4960_v19  ;;  %v2555_v36 = vshll.u32 %v5007_v8, 16 }
  0xd8   : > { %4021 = vmatprep.subr.msk.bf16.mxu1 %vm892_vm9, %v4093_v44  ;;  %v2510_v44 = vsel %vm4523_vm12, %v2505_v1, %v2509_v37  ;;  %v2593_v48 = vshll.u32 %v5005_v22, 16  ;;  %v2597_v62 = vshrl.u32 %v5005_v22, 16  ;;  %v2534_v10 = vsel %vm4523_vm12, %v2529_v58, %v2533_v11 }
  0xd9   : > { %v2542_v33 = vor.u32 %v2541_v26, %v2538_v23  ;;  %v2552_v42 = vor.u32 %v2551_v30, %v4999_v59  ;;  %v2566_v37 = vor.u32 %v2565_v6, %v2562_v14  ;;  %v2579_v41 = vshll.u32 %v5009_v7, 16  ;;  %v5041_v23 = vld [vmem:[#allocation2 + $0x5c] sm:$0x1] }
  0xda   : > { %v2586_v35 = vrot.slane %v2584_v25, 4  ;;  %v5267_v1 = vcombine.low %v4841_v50, %v4856_v45  ;;  %v2576_v19 = vor.u32 %v2575_v27, %v5011_v40  ;;  %v2589_v38 = vrot.slane %v2587_v57, 5 }
  0xdb   : > { %v2608_v11 = vshrl.u32 %v2457_v32, 16  ;;  %v2611_v58 = vshll.u32 %v2457_v32, 16  ;;  %v5043_v26 = vrot.slane %v2593_v48, 5  ;;  %v2599_v30 = vrot.slane %v2597_v62, 4  ;;  %v2460_v32 = vld [vmem:[#allocation2 + $0x6c] sm:$0xf] }
  0xdc   : > { %v2617_v50 = vshll.u32 %v5026_v63, 16  ;;  %v2621_v45 = vshrl.u32 %v5026_v63, 16  ;;  %v3517_v14 = vcombine.low %v2500_v53, %v2510_v44  ;;  %v2960_v6 = vsel %vm892_vm9, %v4905_v39, 0 }
  0xdd   : > { %3847 = vmatmul.mubr.msk.bf16.gmra.mrb[12].mxu0 %vm867_vm13, %v4084_v0  ;;  %v5268_v0 = vcombine.low %v4860_v47, %v4869_v24  ;;  %v3518_v25 = vcombine.low %v2524_v12, %v2534_v10  ;;  %v2543_v27 = vrot.slane %v2542_v33, 4  ;;  %v2553_v57 = vrot.slane %v2552_v42, 4  ;;  %v5058_v33 = vld [vmem:[#allocation2 + $0x68] sm:$0x1] }
  0xde   : > { %3767 = vmatmul.mubr.msk.bf16.gmra.mrb[4].mxu1 %vm867_vm13, %v5267_v1  ;;  %3852 = vmatprep.mubr.msk.bf16.mxu0 %vm867_vm13, %v3516_v29  ;;  %v2557_v29 = vrot.slane %v2555_v36, 5  ;;  %v2567_v47 = vrot.slane %v2566_v37, 4  ;;  %v2581_v24 = vrot.slane %v2579_v41, 5  ;;  %v2577_v1 = vrot.slane %v2576_v19, 4 }
  0xdf   : > { %3770 = vmatprep.mubr.msk.bf16.mxu1 %vm867_vm13, %v5268_v0  ;;  %v2603_v48 = vshll.u32 %v5041_v23, 16  ;;  %v2610_v0 = vrot.slane %v2608_v11, 4  ;;  %v2613_v62 = vrot.slane %v2611_v58, 5  ;;  %v2590_v20 = vor.u32 %v2589_v38, %v2586_v35 }
  0xe0   : > { %v2600_v53 = vor.u32 %v2599_v30, %v5043_v26  ;;  %v5053_v44 = vrot.slane %v2617_v50, 5  ;;  %v2623_v39 = vrot.slane %v2621_v45, 4  ;;  %v1765_v12 = vor.u32 %v4966_v13, %v4956_v21 }
  0xe1   : > { %v1768_v10 = vshll.u32 %v4762_v43, 16  ;;  %v2632_v36 = vshrl.u32 %v2460_v32, 16  ;;  %v2635_v42 = vshll.u32 %v2460_v32, 16  ;;  %v2548_v37 = vsel %vm4523_vm12, %v2543_v27, %v4999_v59 }
  0xe2   : > { %v2558_v41 = vsel %vm4523_vm12, %v2553_v57, %v2557_v29  ;;  %v2641_v35 = vshll.u32 %v5050_v4, 16  ;;  %v2645_v19 = vshrl.u32 %v5050_v4, 16  ;;  %v5269_v43 = vcombine.low %v4879_v28, %v4893_v17 }
  0xe3   : > { %v2572_v13 = vsel %vm4523_vm12, %v2567_v47, %v5011_v40  ;;  %v2582_v59 = vsel %vm4523_vm12, %v2577_v1, %v2581_v24  ;;  %v2605_v38 = vrot.slane %v2603_v48, 5  ;;  %v2614_v11 = vor.u32 %v2613_v62, %v2610_v0  ;;  %v4085_v24 = vld [vmem:[#allocation2 + $0xc] sm:$0xff]   ;;  %v1619_v62 = vld [vmem:[#allocation2 + $0x48] sm:$0xf] }
  0xe4   : > { %v5270_v58 = vcombine.low %v4916_v60, %v4927_v2  ;;  %v2591_v28 = vrot.slane %v2590_v20, 4  ;;  %v2601_v17 = vrot.slane %v2600_v53, 4  ;;  %v2624_v30 = vor.u32 %v2623_v39, %v5053_v44  ;;  %v2821_v39 = vld [vmem:[#allocation2 + $0x18] sm:$0xe] }
  0xe5   : > { %3853 = vmatmul.mubr.msk.bf16.vlgmr.msra.gmra.mrb[0].mxu0 %vm867_vm13, %v3517_v14  ;;  %v2627_v50 = vshll.u32 %v5058_v33, 16  ;;  %v2634_v45 = vrot.slane %v2632_v36, 4  ;;  %v2637_v40 = vrot.slane %v2635_v42, 5  ;;  %v3519_v14 = vcombine.low %v2548_v37, %v2558_v41 }
  0xe6   : > { %3771 = vmatmul.mubr.msk.bf16.gmra.mrb[8].mxu1 %vm867_vm13, %v5269_v43  ;;  %3869 = vmatpush3.bf16.msra.mxu0 %v2960_v6  ;;  %v5084_v6 = vld [vmem:[#allocation2 + $0x74] sm:$0x1]  ;;  %v5086_v29 = vrot.slane %v2641_v35, 5  ;;  %v2647_v27 = vrot.slane %v2645_v19, 4  ;;  %v1766_v57 = vrot.slane %v1765_v12, 4  ;;  %v1770_v60 = vrot.slane %v1768_v10, 5 }
  0xe7   : > { %3774 = vmatprep.mubr.msk.bf16.mxu1 %vm867_vm13, %v5270_v58  ;;  %3856 = vmatprep.mubr.msk.bf16.mxu0 %vm867_vm13, %v3518_v25  ;;  %v3520_v2 = vcombine.low %v2572_v13, %v2582_v59  ;;  %v2615_v47 = vrot.slane %v2614_v11, 4  ;;  %v2596_v20 = vsel %vm4523_vm12, %v2591_v28, %v5043_v26  ;;  %v2606_v25 = vsel %vm4523_vm12, %v2601_v17, %v2605_v38  ;;  %v4087_v58 = vld [vmem:[#allocation2 + $0x24] sm:$0xff]   ;;  %v1616_v28 = vld [vmem:[#allocation2 + $0x3c] sm:$0xf] }
  0xe8   : > { %v2625_v32 = vrot.slane %v2624_v30, 4  ;;  %v2629_v1 = vrot.slane %v2627_v50, 5  ;;  %v2638_v48 = vor.u32 %v2637_v40, %v2634_v45  ;;  %v2651_v0 = vshll.u32 %v5084_v6, 16  ;;  %v2822_v45 = vld [vmem:[#allocation2 + $0x24] sm:$0xe] }
  0xe9   : > { %v2648_v53 = vor.u32 %v2647_v27, %v5086_v29  ;;  %v2855_v12 = vrot.slane %v4883_v56, 5  ;;  %v5271_v10 = vcombine.low %v4949_v34, %v4964_v3  ;;  %v3521_v26 = vcombine.low %v2596_v20, %v2606_v25  ;;  %v2823_v27 = vld [vmem:[#allocation2 + $0x30] sm:$0xe] }
  0xea   : > { %v2620_v36 = vsel %vm4523_vm12, %v2615_v47, %v5053_v44  ;;  %v2630_v42 = vsel %vm4523_vm12, %v2625_v32, %v2629_v1  ;;  %v1749_v37 = vshrl.u32 %v1619_v62, 16  ;;  %v1752_v41 = vshll.u32 %v1619_v62, 16  ;;  %v4086_v44 = vld [vmem:[#allocation2 + $0x18] sm:$0xff]  }
  0xeb   : > { %v1771_v56 = vsel %vm4523_vm12, %v1766_v57, %v1770_v60  ;;  %v2639_v34 = vrot.slane %v2638_v48, 4  ;;  %v2653_v3 = vrot.slane %v2651_v0, 5  ;;  %v3532_v35 = vrot.slane %v2821_v39, 9 }
  0xec   : > { %v2858_v19 = vrot.slane %v4931_v31, 5  ;;  %v2649_v43 = vrot.slane %v2648_v53, 4  ;;  %v2857_v13 = vrot.slane %v2855_v12, 4  ;;  %v1751_v59 = vrot.slane %v1749_v37, 4  ;;  %v4088_v53 = vld [vmem:[#allocation2 + $0x30] sm:$0xff]  }
  0xed   : > { %3857 = vmatmul.mubr.msk.bf16.gmra.mrb[4].mxu0 %vm867_vm13, %v3519_v14  ;;  %v1754_v38 = vrot.slane %v1752_v41, 5  ;;  %v3522_v11 = vcombine.low %v2620_v36, %v2630_v42  ;;  %v2644_v30 = vsel %vm4523_vm12, %v2639_v34, %v5086_v29  ;;  %v2856_v50 = vsel %vm4660_vm0, %v3532_v35, %v2855_v12  ;;  %v2824_v36 = vld [vmem:[#allocation2 + $0x3c] sm:$0xe]  ;;  %v1622_v41 = vld [vmem:[#allocation2 + $0x54] sm:$0xf] }
  0xee   : > { %3775 = vmatmul.mubr.msk.bf16.gmra.mrb[12].mxu1 %vm867_vm13, %v5271_v10  ;;  %3860 = vmatprep.mubr.msk.bf16.mxu0 %vm867_vm13, %v3520_v2  ;;  %v2862_v40 = vrot.slane %v4912_v9, 5  ;;  %v2654_v31 = vsel %vm4523_vm12, %v2649_v43, %v2653_v3  ;;  %v2859_v14 = vsel %vm4660_vm0, %v2857_v13, %v2858_v19  ;;  %v2869_v57 = vrot.slane %v4929_v15, 5  ;;  %v2825_v35 = vld [vmem:[#allocation2 + $0x48] sm:$0xe] }
  0xef   : > { %3780 = vmatprep.mubr.msk.bf16.mxu1 %vm867_vm13, %v4085_v24  ;;  %v1755_v17 = vor.u32 %v1754_v38, %v1751_v59  ;;  %v1725_v29 = vshrl.u32 %v1616_v28, 16  ;;  %v1728_v2 = vshll.u32 %v1616_v28, 16  ;;  %v1734_v9 = vshll.u32 %v4731_v54, 16 }
  0xf0   : > { %v1738_v47 = vshrl.u32 %v4731_v54, 16  ;;  %v3533_v24 = vrot.slane %v2822_v45, 9  ;;  %v2864_v20 = vrot.slane %v2862_v40, 4  ;;  %v2865_v25 = vrot.slane %v4952_v52, 5 }
  0xf1   : > { %v1756_v60 = vrot.slane %v1755_v17, 4  ;;  %v3534_v32 = vrot.slane %v2823_v27, 9  ;;  %v3523_v48 = vcombine.low %v2644_v30, %v2654_v31  ;;  %v3541_v0 = vcombine.low %v2856_v50, %v2859_v14  ;;  %v4090_v30 = vld [vmem:[#allocation2 + $0x48] sm:$0xff]   ;;  %v4091_v31 = vld [vmem:[#allocation2 + $0x54] sm:$0xff]  }
  0xf2   : > { %v2871_v62 = vrot.slane %v2869_v57, 4  ;;  %v2872_v54 = vrot.slane %v4958_v16, 5  ;;  %v1730_v39 = vrot.slane %v1728_v2, 5  ;;  %v5136_v12 = vrot.slane %v1734_v9, 5 }
  0xf3   : > { %v1761_v15 = vsel %vm4523_vm12, %v1756_v60, %v4956_v21  ;;  %v1740_v10 = vrot.slane %v1738_v47, 4  ;;  %v2863_v21 = vsel %vm4660_vm0, %v3533_v24, %v2862_v40  ;;  %v2866_v52 = vsel %vm4660_vm0, %v2864_v20, %v2865_v25  ;;  %v1625_v60 = vld [vmem:[#allocation2 + $0x60] sm:$0xf] }
  0xf4   : > { %v5133_v1 = vcombine.low %v1761_v15, %v1771_v56  ;;  %v2870_v42 = vsel %vm4660_vm0, %v3534_v32, %v2869_v57  ;;  %v2876_v16 = vrot.slane %v4970_v61, 5  ;;  %v1744_v37 = vshll.u32 %v4744_v5, 16  ;;  %v2826_v15 = vld [vmem:[#allocation2 + $0x54] sm:$0xe] }
  0xf5   : > { %3861 = vmatmul.mubr.msk.bf16.gmra.mrb[8].mxu0 %vm867_vm13, %v3521_v26  ;;  %v4089_v26 = vld [vmem:[#allocation2 + $0x3c] sm:$0xff]   ;;  %v2873_v56 = vsel %vm4660_vm0, %v2871_v62, %v2872_v54  ;;  %v1741_v3 = vor.u32 %v1740_v10, %v5136_v12  ;;  %v2883_v19 = vrot.slane %v4977_v46, 5  ;;  %v3542_v43 = vcombine.low %v2863_v21, %v2866_v52 }
  0xf6   : > { %3781 = vmatmul.mubr.msk.bf16.vlgmr.msra.gmra.mrb[0].mxu1 %vm867_vm13, %v4086_v44  ;;  %3864 = vmatprep.mubr.msk.bf16.mxu0 %vm867_vm13, %v3522_v11  ;;  %v3535_v61 = vrot.slane %v2824_v36, 9  ;;  %v2879_v5 = vrot.slane %v5007_v8, 5  ;;  %v1773_v13 = vshrl.u32 %v1622_v41, 16  ;;  %v1776_v59 = vshll.u32 %v1622_v41, 16 }
  0xf7   : > { %3887 = vmatpush3.bf16.msra.mxu1 %v4487_v55  ;;  %3784 = vmatprep.mubr.msk.bf16.mxu1 %vm867_vm13, %v4087_v58  ;;  %v1727_v55 = vrot.slane %v1725_v29, 4  ;;  %v1782_v38 = vshll.u32 %v4770_v49, 16  ;;  %v1786_v44 = vshrl.u32 %v4770_v49, 16  ;;  %v3543_v11 = vcombine.low %v2870_v42, %v2873_v56 }
  0xf8   : > { %v2878_v58 = vrot.slane %v2876_v16, 4  ;;  %v1746_v28 = vrot.slane %v1744_v37, 5  ;;  %v3536_v17 = vrot.slane %v2825_v35, 9  ;;  %v1742_v45 = vrot.slane %v1741_v3, 4 }
  0xf9   : > { %v1731_v34 = vor.u32 %v1730_v39, %v1727_v55  ;;  %v2885_v46 = vrot.slane %v2883_v19, 4  ;;  %v2886_v40 = vrot.slane %v5009_v7, 5  ;;  %v1775_v14 = vrot.slane %v1773_v13, 4  ;;  %v5273_v39 = vld [vmem:[#allocation3_spill] sm:$0xff] }
  0xfa   : > { %v1778_v27 = vrot.slane %v1776_v59, 5  ;;  %v1784_v8 = vrot.slane %v1782_v38, 5  ;;  %v1788_v57 = vrot.slane %v1786_v44, 4  ;;  %v2877_v49 = vsel %vm4660_vm0, %v3535_v61, %v2876_v16  ;;  %v5274_v44 = vld [vmem:[#allocation5_spill] sm:$0xff] }
  0xfb   : > { %v1732_v50 = vrot.slane %v1731_v34, 4  ;;  %v2880_v29 = vsel %vm4660_vm0, %v2878_v58, %v2879_v5  ;;  %v2884_v2 = vsel %vm4660_vm0, %v3536_v17, %v2883_v19  ;;  %v2890_v9 = vrot.slane %v5005_v22, 5  ;;  %v2827_v22 = vld [vmem:[#allocation2 + $0x60] sm:$0xe]  ;;  %v2828_v58 = vld [vmem:[#allocation2 + $0x6c] sm:$0xe] }
  0xfc   : > { %v1747_v47 = vsel %vm4523_vm12, %v1742_v45, %v1746_v28  ;;  %v2887_v24 = vsel %vm4660_vm0, %v2885_v46, %v2886_v40  ;;  %v2897_v20 = vrot.slane %v5026_v63, 5  ;;  %v1797_v25 = vshrl.u32 %v1625_v60, 16  ;;  %v4092_v63 = vld [vmem:[#allocation2 + $0x60] sm:$0xff]  }
  0xfd   : > { %3865 = vmatmul.mubr.msk.bf16.gmra.mrb[12].mxu0 %vm867_vm13, %v3523_v48  ;;  %v1737_v7 = vsel %vm4523_vm12, %v1732_v50, %v5136_v12  ;;  %v1800_v32 = vshll.u32 %v1625_v60, 16  ;;  %v5272_v48 = vld [vmem:[#allocation4_spill] sm:$0xff]  ;;  %v3544_v54 = vcombine.low %v2877_v49, %v2880_v29  ;;  %v1789_v55 = vor.u32 %v1788_v57, %v1784_v8 }
  0xfe   : > { %3785 = vmatmul.mubr.msk.bf16.gmra.mrb[4].mxu1 %vm867_vm13, %v4088_v53  ;;  %3870 = vmatprep.mubr.msk.bf16.mxu0 %vm867_vm13, %v3541_v0  ;;  %v1806_v0 = vshll.u32 %v5272_v48, 16  ;;  %v1810_v62 = vshrl.u32 %v5272_v48, 16  ;;  %v1779_v53 = vor.u32 %v1778_v27, %v1775_v14  ;;  %v1792_v12 = vshll.u32 %v5273_v39, 16 }
  0xff   : > { %3788 = vmatprep.mubr.msk.bf16.mxu1 %vm867_vm13, %v4089_v26  ;;  %v3461_v10 = vcombine.low %v1737_v7, %v1747_v47  ;;  %v3545_v26 = vcombine.low %v2884_v2, %v2887_v24  ;;  %v3537_v21 = vrot.slane %v2826_v15, 9  ;;  %v2893_v52 = vrot.slane %v5041_v23, 5 }
 0x100   : > { %v2892_v36 = vrot.slane %v2890_v9, 4  ;;  %v3538_v42 = vrot.slane %v2827_v22, 9  ;;  %v2899_v16 = vrot.slane %v2897_v20, 4  ;;  %v2900_v37 = vrot.slane %v5058_v33, 5 }
 0x101   : > { %v1799_v41 = vrot.slane %v1797_v25, 4  ;;  %v1802_v56 = vrot.slane %v1800_v32, 5  ;;  %v1808_v34 = vrot.slane %v1806_v0, 5  ;;  %v1812_v3 = vrot.slane %v1810_v62, 4 }
 0x102   : > { %v1780_v35 = vrot.slane %v1779_v53, 4  ;;  %v1790_v19 = vrot.slane %v1789_v55, 4  ;;  %v2891_v23 = vsel %vm4660_vm0, %v3537_v21, %v2890_v9  ;;  %v2894_v61 = vsel %vm4660_vm0, %v2892_v36, %v2893_v52 }
 0x103   : > { %v2898_v33 = vsel %vm4660_vm0, %v3538_v42, %v2897_v20  ;;  %v2904_v5 = vrot.slane %v5050_v4, 5  ;;  %v2901_v13 = vsel %vm4660_vm0, %v2899_v16, %v2900_v37  ;;  %v1803_v59 = vor.u32 %v1802_v56, %v1799_v41 }
 0x104   : > { %v1813_v38 = vor.u32 %v1812_v3, %v1808_v34  ;;  %v1785_v28 = vsel %vm4523_vm12, %v1780_v35, %v1784_v8  ;;  %v3547_v50 = vcombine.low %v2898_v33, %v2901_v13  ;;  %v3539_v45 = vrot.slane %v2828_v58, 9 }
 0x105   : > { %3871 = vmatmul.mubr.msk.bf16.vlgmr.msra.gmra.mrb[0].mxu0 %vm867_vm13, %v3542_v43  ;;  %v1794_v43 = vrot.slane %v1792_v12, 5  ;;  %v2906_v4 = vrot.slane %v2904_v5, 4  ;;  %v2907_v46 = vrot.slane %v5084_v6, 5 }
 0x106   : > { %3789 = vmatmul.mubr.msk.bf16.gmra.mrb[8].mxu1 %vm867_vm13, %v4090_v30  ;;  %3874 = vmatprep.mubr.msk.bf16.mxu0 %vm867_vm13, %v3543_v11  ;;  %v1816_v11 = vshll.u32 %v5274_v44, 16  ;;  %v3546_v30 = vcombine.low %v2891_v23, %v2894_v61  ;;  %v1814_v14 = vrot.slane %v1813_v38, 4  ;;  %v2905_v8 = vsel %vm4660_vm0, %v3539_v45, %v2904_v5 }
 0x107   : > { %3792 = vmatprep.mubr.msk.bf16.mxu1 %vm867_vm13, %v4091_v31  ;;  %v1795_v17 = vsel %vm4523_vm12, %v1790_v19, %v1794_v43  ;;  %v1804_v31 = vrot.slane %v1803_v59, 4  ;;  %v2908_v57 = vsel %vm4660_vm0, %v2906_v4, %v2907_v46 }
 0x108   : > { %v3463_v40 = vcombine.low %v1785_v28, %v1795_v17  ;;  %v1818_v27 = vrot.slane %v1816_v11, 5  ;;  %v3548_v49 = vcombine.low %v2905_v8, %v2908_v57 }
 0x109   : > { %v1809_v6 = vsel %vm4523_vm12, %v1804_v31, %v1808_v34 }
 0x10a   : > { %v1819_v60 = vsel %vm4523_vm12, %v1814_v14, %v1818_v27 }
 0x10b   : > { %v3464_v29 = vcombine.low %v1809_v6, %v1819_v60 }
 0x10d   : > { %3875 = vmatmul.mubr.msk.bf16.gmra.mrb[4].mxu0 %vm867_vm13, %v3544_v54 }
 0x10e   : > { %3793 = vmatmul.mubr.msk.bf16.gmra.mrb[12].mxu1 %vm867_vm13, %v4092_v63  ;;  %3878 = vmatprep.mubr.msk.bf16.mxu0 %vm867_vm13, %v3545_v26 }
 0x10f   : > { %3806 = vmatprep.mubr.msk.bf16.mxu1 %vm867_vm13, %v3461_v10 }
 0x115   : > { %3879 = vmatmul.mubr.msk.bf16.gmra.mrb[8].mxu0 %vm867_vm13, %v3546_v30 }
 0x116   : > { %3807 = vmatmul.mubr.msk.bf16.vlgmr.msra.gmra.mrb[8].mxu1 %vm867_vm13, %v5133_v1  ;;  %3882 = vmatprep.mubr.msk.bf16.mxu0 %vm867_vm13, %v3547_v50  ;;  %v4136_v1 = vmov 0.0  }
 0x117   : > { %3810 = vmatprep.mubr.msk.bf16.mxu1 %vm867_vm13, %v3463_v40  ;;  %3155 = vst [vmem:[%s4224_s13] sm:$0xff] %v4136_v1 }
 0x11d   : > { %3883 = vmatmul.mubr.msk.bf16.gmra.mrb[12].mxu0 %vm867_vm13, %v3548_v49 }
 0x11e   : > { %3811 = vmatmul.mubr.msk.bf16.gmra.mrb[12].mxu1 %vm867_vm13, %v3464_v29 }
 0x1c9   : > { %v3782_v2 = vpop.f32.mrb[0].mxu1 }
 0x1ca   : > { %v1525_v9 = vpop.f32.mrb[1].mxu1 }
 0x1cb   : > { %v3783_v18 = vpop.f32.mrb[2].mxu1 }
 0x1cc   : > { %v1528_v7 = vpop.f32.mrb[3].mxu1 }
 0x1d1   : > { %v3786_v47 = vpop.f32.mrb[4].mxu1 }
 0x1d2   : > { %v1541_v24 = vpop.f32.mrb[5].mxu1 }
 0x1d3   : > { %v3787_v15 = vpop.f32.mrb[6].mxu1 }
 0x1d4   : > { %v1544_v20 = vpop.f32.mrb[7].mxu1 }
 0x1d8   : > { %v3872_v51 = vpop.f32.mrb[0].mxu0 }
 0x1d9   : > { %v3888_v22 = vadd.f32 %v3872_v51, %v3782_v2  ;;  %v2996_v25 = vpop.f32.mrb[1].mxu0 }
 0x1da   : > { %v3889_v32 = vadd.f32 %v2996_v25, %v1525_v9  ;;  %v3873_v48 = vpop.f32.mrb[2].mxu0 }
 0x1db   : > { %v3890_v0 = vadd.f32 %v3873_v48, %v3783_v18  ;;  %v2999_v62 = vpop.f32.mrb[3].mxu0  ;;  %v3180_v26 = vmul.f32 %v3888_v22, %v3888_v22 }
 0x1dc   : > { %v3891_v54 = vadd.f32 %v2999_v62, %v1528_v7  ;;  %v3178_v55 = vmul.f32 %v3889_v32, %v3889_v32 }
 0x1dd   : > { %v3604_v53 = vpack.c.bf16 %v3890_v0, %v3888_v22  ;;  %v3181_v16 = vmul.f32 %v3890_v0, %v3890_v0 }
 0x1de   : > { %v3599_v39 = vpack.c.bf16 %v3891_v54, %v3889_v32  ;;  %v3156_v12 = vadd.f32 %v3891_v54, %v3889_v32  ;;  %v3179_v10 = vmul.f32 %v3891_v54, %v3891_v54 }
 0x1df   : > { %3636 = vst [vmem:[%s4199_s30 + $0x8] sm:$0xff] %v3604_v53  }
 0x1e0   : > { %3600 = vst [vmem:[%s4199_s30] sm:$0xff] %v3599_v39   ;;  %v3157_v21 = vadd.f32 %v3888_v22, %v3156_v12  ;;  %v3194_v52 = vadd.f32 %v3179_v10, %v3178_v55  ;;  %v3876_v63 = vpop.f32.mrb[4].mxu0 }
 0x1e1   : > { %v3892_v36 = vadd.f32 %v3876_v63, %v3786_v47  ;;  %v3012_v42 = vpop.f32.mrb[5].mxu0 }
 0x1e2   : > { %v3195_v37 = vadd.f32 %v3194_v52, %v3180_v26  ;;  %v3893_v41 = vadd.f32 %v3012_v42, %v1541_v24  ;;  %v3158_v56 = vadd.f32 %v3890_v0, %v3157_v21  ;;  %v3877_v34 = vpop.f32.mrb[6].mxu0 }
 0x1e3   : > { %v3894_v3 = vadd.f32 %v3877_v34, %v3787_v15  ;;  %v3015_v35 = vpop.f32.mrb[7].mxu0  ;;  %v3184_v44 = vmul.f32 %v3892_v36, %v3892_v36 }
 0x1e4   : > { %v3159_v19 = vadd.f32 %v3893_v41, %v3158_v56  ;;  %v3182_v43 = vmul.f32 %v3893_v41, %v3893_v41  ;;  %v3196_v23 = vadd.f32 %v3195_v37, %v3181_v16  ;;  %v3895_v61 = vadd.f32 %v3015_v35, %v1544_v20 }
 0x1e5   : > { %v3614_v33 = vpack.c.bf16 %v3894_v3, %v3892_v36  ;;  %v3185_v50 = vmul.f32 %v3894_v3, %v3894_v3 }
 0x1e6   : > { %v3197_v5 = vadd.f32 %v3196_v23, %v3182_v43  ;;  %v3609_v13 = vpack.c.bf16 %v3895_v61, %v3893_v41  ;;  %v3160_v59 = vadd.f32 %v3895_v61, %v3159_v19  ;;  %v3183_v38 = vmul.f32 %v3895_v61, %v3895_v61 }
 0x1e7   : > { %3638 = vst [vmem:[%s4199_s30 + $0x18] sm:$0xff] %v3614_v33  }
 0x1e8   : > { %3637 = vst [vmem:[%s4199_s30 + $0x10] sm:$0xff] %v3609_v13   ;;  %v3161_v11 = vadd.f32 %v3892_v36, %v3160_v59  ;;  %v3198_v58 = vadd.f32 %v3197_v5, %v3183_v38  ;;  %v3880_v28 = vpop.f32.mrb[8].mxu0 }
 0x1e9   : > { %v3808_v17 = vpop.f32.mrb[8].mxu1  ;;  %v3028_v30 = vpop.f32.mrb[9].mxu0 }
 0x1ea   : > { %v3199_v45 = vadd.f32 %v3198_v58, %v3184_v44  ;;  %v3896_v4 = vadd.f32 %v3880_v28, %v3808_v17  ;;  %v1939_v46 = vpop.f32.mrb[9].mxu1  ;;  %v3162_v40 = vadd.f32 %v3894_v3, %v3161_v11  ;;  %v3881_v31 = vpop.f32.mrb[10].mxu0 }
 0x1eb   : > { %v3897_v14 = vadd.f32 %v3028_v30, %v1939_v46  ;;  %v3809_v27 = vpop.f32.mrb[10].mxu1  ;;  %v3031_v8 = vpop.f32.mrb[11].mxu0 }
 0x1ec   : > { %v3200_v57 = vadd.f32 %v3199_v45, %v3185_v50  ;;  %v3898_v6 = vadd.f32 %v3881_v31, %v3809_v27  ;;  %v1942_v60 = vpop.f32.mrb[11].mxu1  ;;  %v3188_v15 = vmul.f32 %v3896_v4, %v3896_v4 }
 0x1ed   : > { %v3163_v49 = vadd.f32 %v3897_v14, %v3162_v40  ;;  %v3186_v29 = vmul.f32 %v3897_v14, %v3897_v14  ;;  %v3899_v1 = vadd.f32 %v3031_v8, %v1942_v60 }
 0x1ee   : > { %v3624_v2 = vpack.c.bf16 %v3898_v6, %v3896_v4  ;;  %v3189_v62 = vmul.f32 %v3898_v6, %v3898_v6 }
 0x1ef   : > { %v3201_v9 = vadd.f32 %v3200_v57, %v3186_v29  ;;  %v3619_v18 = vpack.c.bf16 %v3899_v1, %v3897_v14  ;;  %v3164_v7 = vadd.f32 %v3899_v1, %v3163_v49  ;;  %v3187_v47 = vmul.f32 %v3899_v1, %v3899_v1 }
 0x1f0   : > { %3640 = vst [vmem:[%s4199_s30 + $0x28] sm:$0xff] %v3624_v2   ;;  %v3884_v24 = vpop.f32.mrb[12].mxu0 }
 0x1f1   : > { %3639 = vst [vmem:[%s4199_s30 + $0x20] sm:$0xff] %v3619_v18   ;;  %v3165_v20 = vadd.f32 %v3896_v4, %v3164_v7  ;;  %v3202_v51 = vadd.f32 %v3201_v9, %v3187_v47  ;;  %v3812_v22 = vpop.f32.mrb[12].mxu1  ;;  %v3044_v25 = vpop.f32.mrb[13].mxu0 }
 0x1f2   : > { %v3900_v32 = vadd.f32 %v3884_v24, %v3812_v22  ;;  %v1955_v48 = vpop.f32.mrb[13].mxu1  ;;  %v3885_v0 = vpop.f32.mrb[14].mxu0 }
 0x1f3   : > { %v3203_v54 = vadd.f32 %v3202_v51, %v3188_v15  ;;  %v3901_v53 = vadd.f32 %v3044_v25, %v1955_v48  ;;  %v3166_v55 = vadd.f32 %v3898_v6, %v3165_v20  ;;  %v3813_v39 = vpop.f32.mrb[14].mxu1  ;;  %v3047_v12 = vpop.f32.mrb[15].mxu0 }
 0x1f4   : > { %v3902_v10 = vadd.f32 %v3885_v0, %v3813_v39  ;;  %v1958_v26 = vpop.f32.mrb[15].mxu1  ;;  %v3192_v34 = vmul.f32 %v3900_v32, %v3900_v32 }
 0x1f5   : > { %v3167_v21 = vadd.f32 %v3901_v53, %v3166_v55  ;;  %v3190_v52 = vmul.f32 %v3901_v53, %v3901_v53  ;;  %v3204_v63 = vadd.f32 %v3203_v54, %v3189_v62  ;;  %v3903_v36 = vadd.f32 %v3047_v12, %v1958_v26 }
 0x1f6   : > { %v3634_v42 = vpack.c.bf16 %v3902_v10, %v3900_v32  ;;  %v3193_v19 = vmul.f32 %v3902_v10, %v3902_v10 }
 0x1f7   : > { %v3205_v16 = vadd.f32 %v3204_v63, %v3190_v52  ;;  %v3629_v37 = vpack.c.bf16 %v3903_v36, %v3901_v53  ;;  %v3168_v41 = vadd.f32 %v3903_v36, %v3167_v21  ;;  %v3191_v56 = vmul.f32 %v3903_v36, %v3903_v36 }
 0x1f8   : > { %3642 = vst [vmem:[%s4199_s30 + $0x38] sm:$0xff] %v3634_v42  }
 0x1f9   : > { %3641 = vst [vmem:[%s4199_s30 + $0x30] sm:$0xff] %v3629_v37   ;;  %v3169_v3 = vadd.f32 %v3900_v32, %v3168_v41  ;;  %v3206_v35 = vadd.f32 %v3205_v16, %v3191_v56 }
 0x1fb   : > { %v3170_v43 = vadd.f32 %v3902_v10, %v3169_v3  ;;  %v3207_v23 = vadd.f32 %v3206_v35, %v3192_v34 }
 0x1fd   : > { %v3171_v61 = vrot.slane %v3170_v43, 4  ;;  %v3208_v33 = vadd.f32 %v3207_v23, %v3193_v19 }
 0x1ff   : > { %v3172_v5 = vadd.f32 %v3171_v61, %v3170_v43  ;;  %v3209_v13 = vrot.slane %v3208_v33, 4 }
 0x201   : > { %v3173_v59 = vrot.slane %v3172_v5, 2  ;;  %v3210_v38 = vadd.f32 %v3209_v13, %v3208_v33 }
 0x203   : > { %v3174_v44 = vadd.f32 %v3173_v59, %v3172_v5  ;;  %v3211_v11 = vrot.slane %v3210_v38, 2 }
 0x205   : > { %v3175_v58 = vrot.slane %v3174_v44, 1  ;;  %v3212_v28 = vadd.f32 %v3211_v11, %v3210_v38 }
 0x207   : > { %v3176_v17 = vadd.f32 %v3175_v58, %v3174_v44  ;;  %v3213_v30 = vrot.slane %v3212_v28, 1 }
 0x209   : > { %3177 = vst [vmem:[%s4224_s13] sm:$0x1] %v3176_v17  ;;  %v3214_v50 = vadd.f32 %v3213_v30, %v3212_v28 }
 0x20b   : > { %3215 = vst [vmem:[%s4224_s13 + $0x1] sm:$0x1] %v3214_v50 }
 0x20c PF: > { %s14_s16 = sadd.s32 1, %s4132_s16   ;;  %s5275_s12 = smov %s4124_s14 }
 0x20d   : > { %p11_p12 = scmp.ge.s32.totalorder %s14_s16, 6   ;;  %s5276_s13 = smov %s4128_s15 }
 0x20e   : > { %s5277_s14 = smov %s5280_s17  ;;  %s5278_s15 = smov %s5284_s18 }
 0x20f   :  { %13 = sbr.rel (!%p11_p12) target bundleno = 3 (0x3), region = 101 }

</bundles_post_ra>
